<compile_context>
chip_gen: v5e
topology: v5e:2x2
jax: 0.10.0
libtpu: 0.0.40
codegen_flags: <defaults>
</compile_context>

<pallas_src>
import math

import jax
import jax.numpy as jnp
from jax.experimental import pallas as pl
from jax.experimental.pallas import tpu as pltpu

# ----------------------------- configuration --------------------------------
BATCH = 2
STATE_DIM = 4
ACTION_DIM = 2
HORIZON = 8
HIDDEN = 32
ENV_DIM = 8
FLOW_LENGTH = 2
IMG_C, IMG_H, IMG_W = 1, 16, 16
IMG_FLAT = IMG_C * IMG_H * IMG_W                      # 256

BASE_CTX = STATE_DIM + ACTION_DIM * HORIZON + 1       # 21: [state | actions | noise_mag]
BASE_AUG = BASE_CTX + 1                               # 22: + constant-1 column (bias fold)
C_FLOW = HORIZON                                      # 8   (contact flow dim)
D_FLOW = STATE_DIM * HORIZON                          # 32  (dynamic flow dim)
C_D1, C_D2 = C_FLOW // 2, C_FLOW - C_FLOW // 2        # 4, 4
D_D1, D_D2 = D_FLOW // 2, D_FLOW - D_FLOW // 2        # 16, 16
NC = FLOW_LENGTH + 1                                  # couplings per RealNVP flow

CTXP_W = (2 + 2 * NC) * HIDDEN                        # 256 (hoisted ctx projection width)
CONP_W = (1 + NC) * HIDDEN                            # 128 (hoisted x_contact projection)
OUT_W = D_FLOW + 8                                    # 40: [traj | log_prob broadcast(8)]

_LOG_2PI = math.log(2.0 * math.pi)


# --------------------------- weight slab layout ------------------------------
def _plan(segs):
    plan, off = {}, 0
    for name, width in segs:
        plan[name] = (off, width)
        off += width
    return plan, off


_W8_SEGS = [('Wenv', CTXP_W), ('Wcon', CONP_W)]
_W32_SEGS = ([('we2', ENV_DIM), ('cp_w2', HIDDEN), ('cp_wh', 2 * C_FLOW),
              ('dp_w2', HIDDEN), ('dp_wh', 2 * D_FLOW)]
             + [(f'c_{n}_{j}', w) for j in range(NC)
                for n, w in (('w1', HIDDEN), ('wst', 2 * C_D2), ('wst2', 2 * C_D2))]
             + [(f'd_{n}_{j}', w) for j in range(NC)
                for n, w in (('w1', HIDDEN), ('wst', 2 * D_D2), ('wst2', 2 * D_D2))])
_W4_SEGS = ([('c_win0', HIDDEN)]
            + [(f'c_wp{k}_{j}', C_FLOW + HIDDEN) for j in range(1, NC) for k in (1, 2)]
            + [('TT', D_FLOW)])
_W16_SEGS = ([('d_win0', HIDDEN)]
             + [(f'd_wp{k}_{j}', D_FLOW + HIDDEN) for j in range(1, NC) for k in (1, 2)]
             + [('CM1', D_FLOW), ('CM2', D_FLOW)])
_B_SEGS = ([('be1', HIDDEN), ('be2', ENV_DIM),
            ('cp_b2', HIDDEN), ('cp_bh', 2 * C_FLOW),
            ('dp_b2', HIDDEN), ('dp_bh', 2 * D_FLOW)]
           + [(f'c_{n}_{j}', w) for j in range(NC)
              for n, w in (('b1', HIDDEN), ('bstp', 2 * C_D2))]
           + [(f'c_bc_{j}', C_FLOW + HIDDEN) for j in range(1, NC)]
           + [(f'd_{n}_{j}', w) for j in range(NC)
              for n, w in (('b1', HIDDEN), ('bstp', 2 * D_D2))]
           + [(f'd_bc_{j}', D_FLOW + HIDDEN) for j in range(1, NC)]
           + [('mean_t', D_FLOW), ('lp_const', 8)])

_W8_PLAN, _W8_W = _plan(_W8_SEGS)
_W32_PLAN, _W32_W = _plan(_W32_SEGS)
_W4_PLAN, _W4_W = _plan(_W4_SEGS)
_W16_PLAN, _W16_W = _plan(_W16_SEGS)
_B_PLAN, _B_W = _plan(_B_SEGS)

SLAB_NAMES = ('we1', 'Wctx', 'W8', 'W32', 'W4', 'W16', 'B')


# ------------------------------ fused Pallas kernel --------------------------
def _fused_kernel(base_ref, img_ref, eps_c_ref, eps_d_ref,
                  we1_ref, wctx_ref, w8_ref, w32_ref, w4_ref, w16_ref, b_ref,
                  out_ref):
    f32 = jnp.float32

    def mm(a, b):
        return jnp.dot(a, b, preferred_element_type=f32)

    def relu(x):
        return jnp.maximum(x, 0.0)

    def _seg(ref, plan, name):
        off, width = plan[name]
        return ref[:, pl.ds(off, width)]

    w8 = lambda n: _seg(w8_ref, _W8_PLAN, n)
    w32 = lambda n: _seg(w32_ref, _W32_PLAN, n)
    w4 = lambda n: _seg(w4_ref, _W4_PLAN, n)
    w16 = lambda n: _seg(w16_ref, _W16_PLAN, n)
    bb = lambda n: _seg(b_ref, _B_PLAN, n)

    base = base_ref[...]                                    # (T, 22), last column == 1
    T = base.shape[0]

    # ---- Encoder.encode ----
    # TODO(synk): Encoder source not provided; approximated as flatten -> 2-layer MLP.
    eh = relu(mm(img_ref[...], we1_ref[...]) + bb('be1'))
    env = mm(eh, w32('we2')) + bb('be2')                    # (T, ENV_DIM)

    # ---- hoisted context projection (priors + all couplings; biases folded via 1-col) ----
    ctxp = mm(base, wctx_ref[...]) + mm(env, w8('Wenv'))    # (T, 256)

    # start-state tail (already scaled by state_std), off the critical path
    start_tail = mm(base[:, :STATE_DIM], w4('TT'))          # (T, 32)

    def run_flow(z, d, d1, d2, ctx_at, pref, wsel):
        # RealNVP flow: coupling_0, [ActNorm+RandomPermutation folded host-side into
        # the next coupling's input matmuls], ..., coupling_{NC-1}.
        # TODO(synk): ResidualNet internals / ActNorm data-dependent init assumed.
        h1 = z[:, :d1]
        h2 = z[:, d1:]
        g0 = relu(mm(h1, wsel(pref + '_win0')) + ctx_at(0))
        r = relu(mm(g0, w32(pref + '_w1_0')) + bb(pref + '_b1_0'))
        st = (mm(g0, w32(pref + '_wst_0')) + mm(r, w32(pref + '_wst2_0'))
              + bb(pref + '_bstp_0'))
        s = jnp.tanh(st[:, :d2])
        x2 = h2 * jnp.exp(s) + st[:, d2:]
        s_sum = jnp.sum(s, axis=1, keepdims=True)
        for j in range(1, NC):
            comb = (mm(h1, wsel(f'{pref}_wp1_{j}')) + mm(x2, wsel(f'{pref}_wp2_{j}'))
                    + bb(f'{pref}_bc_{j}'))                 # (T, d + HIDDEN)
            h1 = comb[:, :d1]
            h2 = comb[:, d1:d]
            g0 = relu(comb[:, d:] + ctx_at(j))
            r = relu(mm(g0, w32(f'{pref}_w1_{j}')) + bb(f'{pref}_b1_{j}'))
            st = (mm(g0, w32(f'{pref}_wst_{j}')) + mm(r, w32(f'{pref}_wst2_{j}'))
                  + bb(f'{pref}_bstp_{j}'))
            s = jnp.tanh(st[:, :d2])
            x2 = h2 * jnp.exp(s) + st[:, d2:]
            s_sum = s_sum + jnp.sum(s, axis=1, keepdims=True)
        return h1, x2, s_sum

    # ---------------- contact ConditionalPrior (sample) ----------------
    # TODO(synk): ConditionalPrior internals assumed (2-layer ReLU MLP -> mu, log_sigma).
    cp_h1 = relu(ctxp[:, 0:HIDDEN])
    cp_h2 = relu(mm(cp_h1, w32('cp_w2')) + bb('cp_b2'))
    cp_head = mm(cp_h2, w32('cp_wh')) + bb('cp_bh')         # (T, 2*C_FLOW)
    mu_c = cp_head[:, :C_FLOW]
    ls_c = cp_head[:, C_FLOW:]
    eps_c = eps_c_ref[...]
    lp = jnp.sum(-0.5 * eps_c * eps_c - ls_c, axis=1, keepdims=True)
    z_c = mu_c + jnp.exp(ls_c) * eps_c

    # ---------------- contact RealNVP flow ----------------
    c_off = 2 * HIDDEN
    c_ctx = lambda j: ctxp[:, c_off + j * HIDDEN: c_off + (j + 1) * HIDDEN]
    h1c, x2c, s_c = run_flow(z_c, C_FLOW, C_D1, C_D2, c_ctx, 'c', w4)
    lp = lp - s_c

    # x_contact = sign-ish of [h1c | x2c]; hoisted context contribution computed
    # as two half matmuls (no lane concat on the critical path).
    sg1 = (h1c > 0.0).astype(f32) * 2.0 - 1.0
    sg2 = (x2c > 0.0).astype(f32) * 2.0 - 1.0
    wcon = w8('Wcon')                                       # (HORIZON, 128)
    conp = mm(sg1, wcon[:C_D1, :]) + mm(sg2, wcon[C_D1:, :])  # (T, 128)

    # ---------------- dynamic ConditionalPrior (sample) ----------------
    dp_h1 = relu(ctxp[:, HIDDEN:2 * HIDDEN] + conp[:, 0:HIDDEN])
    dp_h2 = relu(mm(dp_h1, w32('dp_w2')) + bb('dp_b2'))
    dp_head = mm(dp_h2, w32('dp_wh')) + bb('dp_bh')         # (T, 2*D_FLOW)
    mu_d = dp_head[:, :D_FLOW]
    ls_d = dp_head[:, D_FLOW:]
    eps_d = eps_d_ref[...]
    lp = lp + jnp.sum(-0.5 * eps_d * eps_d - ls_d, axis=1, keepdims=True)
    z_d = mu_d + jnp.exp(ls_d) * eps_d

    # ---------------- dynamic RealNVP flow ----------------
    d_off = (2 + NC) * HIDDEN
    d_ctx = lambda j: (ctxp[:, d_off + j * HIDDEN: d_off + (j + 1) * HIDDEN]
                       + conp[:, (1 + j) * HIDDEN: (2 + j) * HIDDEN])
    h1d, x2d, s_d = run_flow(z_d, D_FLOW, D_D1, D_D2, d_ctx, 'd', w16)
    lp = lp - s_d + bb('lp_const')[:, 0:1]                  # constant ActNorm / log(2pi) terms

    # ---- fused trajectory tail: cumsum + start tiling + de-normalisation ----
    traj = mm(h1d, w16('CM1')) + mm(x2d, w16('CM2')) + start_tail + bb('mean_t')
    out_ref[...] = jnp.concatenate([traj, jnp.broadcast_to(lp, (T, 8))], axis=1)


# ------------------------------- forward wrapper ------------------------------
def double_image_flow_forward(params, start_state, action, image, eps_c, eps_d):
    """DoubleImageFlowModel.forward (flow_type='nvp', condition=True, reverse=False,
    reconstruct=False, output_contact=False).
    TODO(synk): reverse=True / reconstruct=True / output_contact branches not implemented."""
    b = start_state.shape[0]
    s_norm = (start_state - params['state_mean']) / params['state_std']
    a_norm = (action - params['action_mean']) / params['action_std']
    img_norm = (image - params['image_mean']) / params['image_std']
    noise_mag = jnp.zeros((b, 1), jnp.float32)               # reverse=False path
    ones = jnp.ones((b, 1), jnp.float32)                     # constant-1 column: bias fold
    base_ctx = jnp.concatenate([s_norm, a_norm.reshape(b, -1), noise_mag, ones], axis=1)
    img_flat = img_norm.reshape(b, -1)

    # batch tiling: one 8-sublane tile for tiny batches; 128-row tiles (parallel,
    # megacore-shardable grid) for large batches.
    if b <= 128:
        tile_b = max(8, ((b + 7) // 8) * 8)
        bp = tile_b
    else:
        tile_b = 128
        bp = ((b + 127) // 128) * 128
    pad = lambda x: jnp.pad(x, ((0, bp - b), (0, 0)))
    base_p, img_p, ec_p, ed_p = pad(base_ctx), pad(img_flat), pad(eps_c), pad(eps_d)

    slabs = [params[n] for n in SLAB_NAMES]

    def batch_spec(width):
        return pl.BlockSpec((tile_b, width), lambda i: (i, 0))

    def weight_spec(a):
        return pl.BlockSpec(a.shape, lambda i: (0, 0))

    flops_per_row = 2 * (IMG_FLAT * HIDDEN + HIDDEN * ENV_DIM
                         + BASE_AUG * CTXP_W + ENV_DIM * CTXP_W
                         + 2 * HIDDEN * HIDDEN + HIDDEN * (2 * C_FLOW + 2 * D_FLOW)
                         + NC * (HIDDEN * HIDDEN + 4 * HIDDEN * C_D2 + C_D1 * HIDDEN)
                         + NC * (HIDDEN * HIDDEN + 4 * HIDDEN * D_D2 + D_D1 * HIDDEN)
                         + FLOW_LENGTH * (C_FLOW * (C_FLOW + HIDDEN)
                                          + D_FLOW * (D_FLOW + HIDDEN))
                         + HORIZON * CONP_W + D_FLOW * D_FLOW + STATE_DIM * D_FLOW)
    weight_bytes = sum(int(a.size) * 4 for a in slabs)
    act_bytes = int(bp) * (BASE_AUG + IMG_FLAT + C_FLOW + D_FLOW + OUT_W) * 4
    cost = pl.CostEstimate(flops=int(bp) * int(flops_per_row),
                           transcendentals=int(bp) * (C_FLOW + D_FLOW
                                                      + NC * (2 * C_D2 + 2 * D_D2)),
                           bytes_accessed=weight_bytes + act_bytes)

    out = pl.pallas_call(
        _fused_kernel,
        out_shape=jax.ShapeDtypeStruct((bp, OUT_W), jnp.float32),
        grid=(bp // tile_b,),
        in_specs=[batch_spec(BASE_AUG), batch_spec(IMG_FLAT),
                  batch_spec(C_FLOW), batch_spec(D_FLOW)]
                 + [weight_spec(a) for a in slabs],
        out_specs=batch_spec(OUT_W),
        compiler_params=pltpu.CompilerParams(
            dimension_semantics=("parallel",)),               # megacore-shardable batch axis
        cost_estimate=cost,
    )(base_p, img_p, ec_p, ed_p, *slabs)

    traj = out[:b, :D_FLOW].reshape(b, HORIZON, STATE_DIM)
    log_prob = out[:b, D_FLOW]
    image_reconstruct = None                                  # reconstruct=False
    return traj, log_prob, image_reconstruct


# ------------------------------ parameter init -------------------------------
def init_params(key):
    keys = iter(jax.random.split(key, 160))
    hp = jax.lax.Precision.HIGHEST
    hmm = lambda a, b: jnp.dot(a, b, precision=hp)            # one-time host-side folds

    def lin(fi, fo, b_scale=0.01):
        wgt = jax.random.normal(next(keys), (fi, fo), jnp.float32) / jnp.sqrt(float(fi))
        bias = jax.random.normal(next(keys), (1, fo), jnp.float32) * b_scale
        return wgt, bias

    # encoder (TODO(synk): Encoder architecture not provided; flatten -> MLP -> env_code)
    we1, be1 = lin(IMG_FLAT, HIDDEN)
    we2, be2 = lin(HIDDEN, ENV_DIM)

    # contact ConditionalPrior
    cp_w1b, cp_b1 = lin(BASE_CTX, HIDDEN)
    cp_w1e, _ = lin(ENV_DIM, HIDDEN)
    cp_w2, cp_b2 = lin(HIDDEN, HIDDEN)
    cp_wh, cp_bh = lin(HIDDEN, 2 * C_FLOW)

    # dynamic ConditionalPrior (context additionally contains x_contact)
    dp_w1b, dp_b1 = lin(BASE_CTX, HIDDEN)
    dp_w1e, _ = lin(ENV_DIM, HIDDEN)
    dp_w1c, _ = lin(HORIZON, HIDDEN)
    dp_w2, dp_b2 = lin(HIDDEN, HIDDEN)
    dp_wh, dp_bh = lin(HIDDEN, 2 * D_FLOW)

    def make_couplings(d1, d2, with_contact):
        cs = []
        for _ in range(NC):
            c = {}
            c['win_h'], c['b_in'] = lin(d1, HIDDEN)
            c['win_b'], _ = lin(BASE_CTX, HIDDEN)
            c['win_e'], _ = lin(ENV_DIM, HIDDEN)
            if with_contact:
                c['win_c'], _ = lin(HORIZON, HIDDEN)
            c['w1'], c['b1'] = lin(HIDDEN, HIDDEN)
            c['w2'], c['b2'] = lin(HIDDEN, HIDDEN)
            c['wst'], c['bst'] = lin(HIDDEN, 2 * d2)
            cs.append(c)
        return cs

    c_cpl = make_couplings(C_D1, C_D2, with_contact=False)
    d_cpl = make_couplings(D_D1, D_D2, with_contact=True)

    # ActNorms (TODO(synk): data-dependent init (initialized=False) not reproduced)
    ca_ls = jax.random.normal(next(keys), (FLOW_LENGTH, 1, C_FLOW), jnp.float32) * 0.1
    ca_b = jax.random.normal(next(keys), (FLOW_LENGTH, 1, C_FLOW), jnp.float32) * 0.1
    da_ls = jax.random.normal(next(keys), (FLOW_LENGTH, 1, D_FLOW), jnp.float32) * 0.1
    da_b = jax.random.normal(next(keys), (FLOW_LENGTH, 1, D_FLOW), jnp.float32) * 0.1

    def perm_and_mat(k, n):
        perm = jax.random.permutation(k, n)
        mat = jnp.zeros((n, n), jnp.float32).at[perm, jnp.arange(n)].set(1.0)
        return perm, mat

    c_perm, c_pm = zip(*[perm_and_mat(next(keys), C_FLOW) for _ in range(FLOW_LENGTH)])
    d_perm, d_pm = zip(*[perm_and_mat(next(keys), D_FLOW) for _ in range(FLOW_LENGTH)])

    # normalisation buffers (module defaults)
    state_mean = jnp.zeros((STATE_DIM,), jnp.float32)
    state_std = jnp.ones((STATE_DIM,), jnp.float32)
    action_mean = jnp.zeros((ACTION_DIM,), jnp.float32)
    action_std = jnp.ones((ACTION_DIM,), jnp.float32)
    image_mean = jnp.zeros((), jnp.float32)
    image_std = jnp.ones((), jnp.float32)

    # ------------------------- host-side weight folds -------------------------
    # hoisted context projections (biases folded as an extra row -> constant-1 column)
    Wb = jnp.concatenate([cp_w1b, dp_w1b] + [c['win_b'] for c in c_cpl]
                         + [c['win_b'] for c in d_cpl], axis=1)
    Bctx = jnp.concatenate([cp_b1, dp_b1] + [c['b_in'] for c in c_cpl]
                           + [c['b_in'] for c in d_cpl], axis=1)
    Wctx = jnp.concatenate([Wb, Bctx], axis=0)                       # (22, 256)
    Wenv = jnp.concatenate([cp_w1e, dp_w1e] + [c['win_e'] for c in c_cpl]
                           + [c['win_e'] for c in d_cpl], axis=1)    # (8, 256)
    Wcon = jnp.concatenate([dp_w1c] + [c['win_c'] for c in d_cpl], axis=1)  # (8, 128)

    # coupling head fold: st = g0@wst + r@(w2@wst) + (b2@wst + bst)
    def fold_head(c):
        return hmm(c['w2'], c['wst']), hmm(c['b2'], c['wst']) + c['bst']

    c_wst2, c_bstp = zip(*[fold_head(c) for c in c_cpl])
    d_wst2, d_bstp = zip(*[fold_head(c) for c in d_cpl])

    # ActNorm + permutation fold into next coupling's input matmuls
    def fold_actperm(ls, bias, P, d1, win_h_next):
        A = jnp.exp(ls).reshape(-1, 1) * P                           # diag(exp(ls)) @ P
        bprime = hmm(bias, P)
        wp1 = jnp.concatenate([A[:d1, :], hmm(A[:d1, :d1], win_h_next)], axis=1)
        wp2 = jnp.concatenate([A[d1:, :], hmm(A[d1:, :d1], win_h_next)], axis=1)
        bc = jnp.concatenate([bprime, hmm(bprime[:, :d1], win_h_next)], axis=1)
        return wp1, wp2, bc

    c_wp1, c_wp2, c_bc = {}, {}, {}
    d_wp1, d_wp2, d_bc = {}, {}, {}
    for j in range(1, NC):
        c_wp1[j], c_wp2[j], c_bc[j] = fold_actperm(ca_ls[j - 1], ca_b[j - 1], c_pm[j - 1],
                                                   C_D1, c_cpl[j]['win_h'])
        d_wp1[j], d_wp2[j], d_bc[j] = fold_actperm(da_ls[j - 1], da_b[j - 1], d_pm[j - 1],
                                                   D_D1, d_cpl[j]['win_h'])

    # fused trajectory tail: cumsum matrix and start tiling, pre-scaled by state_std
    cum_M = jnp.kron(jnp.triu(jnp.ones((HORIZON, HORIZON), jnp.float32)),
                     jnp.eye(STATE_DIM, dtype=jnp.float32))                      # (32, 32)
    tile_T = jnp.tile(jnp.eye(STATE_DIM, dtype=jnp.float32), (1, HORIZON))       # (4, 32)
    std_t = jnp.tile(state_std, HORIZON).reshape(1, D_FLOW)
    mean_t = jnp.tile(state_mean, HORIZON).reshape(1, D_FLOW)
    CM = cum_M * std_t
    CM1, CM2 = CM[:D_D1, :], CM[D_D1:, :]
    TT = tile_T * std_t

    # constant log-prob terms (ActNorm log-dets + gaussian normalising constants)
    lp_const_val = (-0.5 * _LOG_2PI * (C_FLOW + D_FLOW)
                    - jnp.sum(ca_ls) - jnp.sum(da_ls))
    lp_const = jnp.full((1, 8), lp_const_val, jnp.float32)

    # ------------------------------ slab packing ------------------------------
    def pack(segs, total, arrays, rows):
        parts = []
        for name, width in segs:
            a = arrays[name]
            assert a.shape == (rows, width), (name, a.shape, (rows, width))
            parts.append(a)
        out = jnp.concatenate(parts, axis=1)
        assert out.shape == (rows, total)
        return out

    w8_arrays = {'Wenv': Wenv, 'Wcon': Wcon}
    w32_arrays = {'we2': we2, 'cp_w2': cp_w2, 'cp_wh': cp_wh,
                  'dp_w2': dp_w2, 'dp_wh': dp_wh}
    for j in range(NC):
        w32_arrays[f'c_w1_{j}'] = c_cpl[j]['w1']
        w32_arrays[f'c_wst_{j}'] = c_cpl[j]['wst']
        w32_arrays[f'c_wst2_{j}'] = c_wst2[j]
        w32_arrays[f'd_w1_{j}'] = d_cpl[j]['w1']
        w32_arrays[f'd_wst_{j}'] = d_cpl[j]['wst']
        w32_arrays[f'd_wst2_{j}'] = d_wst2[j]
    w4_arrays = {'c_win0': c_cpl[0]['win_h'], 'TT': TT}
    w16_arrays = {'d_win0': d_cpl[0]['win_h'], 'CM1': CM1, 'CM2': CM2}
    for j in range(1, NC):
        w4_arrays[f'c_wp1_{j}'] = c_wp1[j]
        w4_arrays[f'c_wp2_{j}'] = c_wp2[j]
        w16_arrays[f'd_wp1_{j}'] = d_wp1[j]
        w16_arrays[f'd_wp2_{j}'] = d_wp2[j]
    b_arrays = {'be1': be1, 'be2': be2, 'cp_b2': cp_b2, 'cp_bh': cp_bh,
                'dp_b2': dp_b2, 'dp_bh': dp_bh, 'mean_t': mean_t, 'lp_const': lp_const}
    for j in range(NC):
        b_arrays[f'c_b1_{j}'] = c_cpl[j]['b1']
        b_arrays[f'c_bstp_{j}'] = c_bstp[j]
        b_arrays[f'd_b1_{j}'] = d_cpl[j]['b1']
        b_arrays[f'd_bstp_{j}'] = d_bstp[j]
    for j in range(1, NC):
        b_arrays[f'c_bc_{j}'] = c_bc[j]
        b_arrays[f'd_bc_{j}'] = d_bc[j]

    params = {
        'we1': we1,
        'Wctx': Wctx,
        'W8': pack(_W8_SEGS, _W8_W, w8_arrays, ENV_DIM),
        'W32': pack(_W32_SEGS, _W32_W, w32_arrays, HIDDEN),
        'W4': pack(_W4_SEGS, _W4_W, w4_arrays, C_D1),
        'W16': pack(_W16_SEGS, _W16_W, w16_arrays, D_D1),
        'B': pack(_B_SEGS, _B_W, b_arrays, 1),
        'state_mean': state_mean, 'state_std': state_std,
        'action_mean': action_mean, 'action_std': action_std,
        'image_mean': image_mean, 'image_std': image_std,
        # unfolded copies kept only for the pure-JAX reference check
        '_ref': {
            'cp': {'w1b': cp_w1b, 'w1e': cp_w1e, 'b1': cp_b1, 'w2': cp_w2, 'b2': cp_b2,
                   'wh': cp_wh, 'bh': cp_bh},
            'dp': {'w1b': dp_w1b, 'w1e': dp_w1e, 'w1c': dp_w1c, 'b1': dp_b1,
                   'w2': dp_w2, 'b2': dp_b2, 'wh': dp_wh, 'bh': dp_bh},
            'c_cpl': c_cpl, 'd_cpl': d_cpl,
            'c_perm': list(c_perm), 'd_perm': list(d_perm),
            'ca_ls': ca_ls, 'ca_b': ca_b, 'da_ls': da_ls, 'da_b': da_b,
        },
    }
    assert params['Wctx'].shape == (BASE_AUG, CTXP_W)
    return params


# --------------------------- pure-JAX reference -------------------------------
def reference_forward(params, start_state, action, image, eps_c, eps_d):
    """Plain-JAX re-implementation of the same (assumed) forward, for validation."""
    r = params['_ref']
    b = start_state.shape[0]
    hp = jax.lax.Precision.HIGHEST
    mm = lambda a, wgt: jnp.dot(a, wgt, precision=hp)
    relu = lambda x: jnp.maximum(x, 0.0)

    s = (start_state - params['state_mean']) / params['state_std']
    a = ((action - params['action_mean']) / params['action_std']).reshape(b, -1)
    img = ((image - params['image_mean']) / params['image_std']).reshape(b, -1)
    nm = jnp.zeros((b, 1), jnp.float32)
    base = jnp.concatenate([s, a, nm], axis=1)

    w32p = dict(_W32_PLAN)  # noqa: F841  (kept for symmetry; unused)
    we1 = params['we1']
    # unpack encoder pieces from the packed slabs via the same plans
    def seg(slab, plan, name):
        off, width = plan[name]
        return slab[:, off:off + width]

    eh = relu(mm(img, we1) + seg(params['B'], _B_PLAN, 'be1'))
    env = mm(eh, seg(params['W32'], _W32_PLAN, 'we2')) + seg(params['B'], _B_PLAN, 'be2')

    def prior(pr, contact=None):
        h1 = mm(base, pr['w1b']) + mm(env, pr['w1e']) + pr['b1']
        if contact is not None:
            h1 = h1 + mm(contact, pr['w1c'])
        h1 = relu(h1)
        h2 = relu(mm(h1, pr['w2']) + pr['b2'])
        head = mm(h2, pr['wh']) + pr['bh']
        d = head.shape[1] // 2
        return head[:, :d], head[:, d:]

    def coupling(c, h, d1, d2, contact=None):
        h1, h2 = h[:, :d1], h[:, d1:]
        ctx = mm(base, c['win_b']) + mm(env, c['win_e']) + c['b_in']
        if contact is not None:
            ctx = ctx + mm(contact, c['win_c'])
        g0 = relu(mm(h1, c['win_h']) + ctx)
        rr = relu(mm(g0, c['w1']) + c['b1'])
        g = g0 + mm(rr, c['w2']) + c['b2']
        st = mm(g, c['wst']) + c['bst']
        ss = jnp.tanh(st[:, :d2])
        tt = st[:, d2:]
        return (jnp.concatenate([h1, h2 * jnp.exp(ss) + tt], axis=1),
                -jnp.sum(ss, axis=1, keepdims=True))

    mu, ls = prior(r['cp'])
    lp = jnp.sum(-0.5 * eps_c * eps_c - ls - 0.5 * _LOG_2PI, axis=1, keepdims=True)
    h = mu + jnp.exp(ls) * eps_c
    for i in range(FLOW_LENGTH):
        h, d = coupling(r['c_cpl'][i], h, C_D1, C_D2)
        lp = lp + d
        lsn = r['ca_ls'][i]
        h = h * jnp.exp(lsn) + r['ca_b'][i]
        lp = lp - jnp.sum(lsn, axis=1, keepdims=True)
        h = h[:, r['c_perm'][i]]
    h, d = coupling(r['c_cpl'][FLOW_LENGTH], h, C_D1, C_D2)
    lp = lp + d
    xc = (h > 0.0).astype(jnp.float32) * 2.0 - 1.0

    mu, ls = prior(r['dp'], contact=xc)
    lp = lp + jnp.sum(-0.5 * eps_d * eps_d - ls - 0.5 * _LOG_2PI, axis=1, keepdims=True)
    h = mu + jnp.exp(ls) * eps_d
    for i in range(FLOW_LENGTH):
        h, d = coupling(r['d_cpl'][i], h, D_D1, D_D2, contact=xc)
        lp = lp + d
        lsn = r['da_ls'][i]
        h = h * jnp.exp(lsn) + r['da_b'][i]
        lp = lp - jnp.sum(lsn, axis=1, keepdims=True)
        h = h[:, r['d_perm'][i]]
    h, d = coupling(r['d_cpl'][FLOW_LENGTH], h, D_D1, D_D2, contact=xc)
    lp = lp + d

    xd = h.reshape(b, HORIZON, STATE_DIM)
    traj = (s[:, None, :] + jnp.cumsum(xd, axis=1)) * params['state_std'] + params['state_mean']
    return traj, lp[:, 0]


# ----------------------------------- main ------------------------------------
if __name__ == "__main__":
    key = jax.random.PRNGKey(0)
    kp, ks, ka, ki, kec, ked = jax.random.split(key, 6)
    params = init_params(kp)

    start_state = jax.random.normal(ks, (BATCH, STATE_DIM), jnp.float32)
    action = jax.random.normal(ka, (BATCH, HORIZON, ACTION_DIM), jnp.float32)
    image = jax.random.normal(ki, (BATCH, IMG_C, IMG_H, IMG_W), jnp.float32)
    # torch.randn reparameterisation noise of the two conditional priors (fixed for determinism)
    eps_c = jax.random.normal(kec, (BATCH, C_FLOW), jnp.float32)
    eps_d = jax.random.normal(ked, (BATCH, D_FLOW), jnp.float32)

    fwd = jax.jit(double_image_flow_forward)
    traj, log_prob, recon = fwd(params, start_state, action, image, eps_c, eps_d)
    jax.block_until_ready((traj, log_prob))

    assert traj.shape == (BATCH, HORIZON, STATE_DIM)
    assert log_prob.shape == (BATCH,)
    assert bool(jnp.all(jnp.isfinite(traj))) and bool(jnp.all(jnp.isfinite(log_prob)))
    assert recon is None

    # validate the fused (host-folded) Pallas kernel against the unfolded reference
    traj_ref, lp_ref = reference_forward(params, start_state, action, image, eps_c, eps_d)
    assert bool(jnp.allclose(traj, traj_ref, rtol=2e-2, atol=2e-2)), "traj mismatch vs reference"
    assert bool(jnp.allclose(log_prob, lp_ref, rtol=2e-2, atol=2e-2)), "log_prob mismatch vs reference"

    print("KERNEL_OK")
</pallas_src>

<mosaic_0001>
module attributes {stable_mosaic.version = 11 : i64} {
  func.func @_fused_kernel(%arg0: i32, %arg1: memref<8x22xf32, #tpu.memory_space<vmem>>, %arg2: memref<8x256xf32, #tpu.memory_space<vmem>>, %arg3: memref<8x8xf32, #tpu.memory_space<vmem>>, %arg4: memref<8x32xf32, #tpu.memory_space<vmem>>, %arg5: memref<256x32xf32, #tpu.memory_space<vmem>>, %arg6: memref<22x256xf32, #tpu.memory_space<vmem>>, %arg7: memref<8x384xf32, #tpu.memory_space<vmem>>, %arg8: memref<32x584xf32, #tpu.memory_space<vmem>>, %arg9: memref<4x224xf32, #tpu.memory_space<vmem>>, %arg10: memref<16x352xf32, #tpu.memory_space<vmem>>, %arg11: memref<1x744xf32, #tpu.memory_space<vmem>>, %arg12: memref<8x40xf32, #tpu.memory_space<vmem>>) attributes {dimension_semantics = [#tpu.dimension_semantics<parallel>], iteration_bounds = array<i64: 1>, scalar_prefetch = 0 : i64, scratch_operands = 0 : i64, tpu.core_type = #tpu.core_type<tc>, window_params = [{transform_indices = @transform_0, window_bounds = array<i64: 8, 22>}, {transform_indices = @transform_1, window_bounds = array<i64: 8, 256>}, {transform_indices = @transform_2, window_bounds = array<i64: 8, 8>}, {transform_indices = @transform_3, window_bounds = array<i64: 8, 32>}, {pipeline_mode = #tpu.pipeline_mode<synchronous>, transform_indices = @transform_4, window_bounds = array<i64: 256, 32>}, {pipeline_mode = #tpu.pipeline_mode<synchronous>, transform_indices = @transform_5, window_bounds = array<i64: 22, 256>}, {pipeline_mode = #tpu.pipeline_mode<synchronous>, transform_indices = @transform_6, window_bounds = array<i64: 8, 384>}, {pipeline_mode = #tpu.pipeline_mode<synchronous>, transform_indices = @transform_7, window_bounds = array<i64: 32, 584>}, {pipeline_mode = #tpu.pipeline_mode<synchronous>, transform_indices = @transform_8, window_bounds = array<i64: 4, 224>}, {pipeline_mode = #tpu.pipeline_mode<synchronous>, transform_indices = @transform_9, window_bounds = array<i64: 16, 352>}, {pipeline_mode = #tpu.pipeline_mode<synchronous>, transform_indices = @transform_10, window_bounds = array<i64: 1, 744>}, {transform_indices = @transform_11, window_bounds = array<i64: 8, 40>}]} {
    %c0 = arith.constant 0 : index
    %c0_0 = arith.constant 0 : index
    %0 = vector.load %arg1[%c0, %c0_0] : memref<8x22xf32, #tpu.memory_space<vmem>>, vector<8x22xf32>
    %c0_1 = arith.constant 0 : index
    %c0_2 = arith.constant 0 : index
    %1 = vector.load %arg2[%c0_1, %c0_2] : memref<8x256xf32, #tpu.memory_space<vmem>>, vector<8x256xf32>
    %c0_3 = arith.constant 0 : index
    %c0_4 = arith.constant 0 : index
    %2 = vector.load %arg5[%c0_3, %c0_4] : memref<256x32xf32, #tpu.memory_space<vmem>>, vector<256x32xf32>
    %cst = arith.constant dense<0.000000e+00> : vector<8x32xf32>
    %3 = tpu.matmul %1, %2, %cst {dimension_numbers = #tpu.dot_dimension_numbers<[1], [0], [0], [1], [0, 0, 1, 1], [], []>} : vector<8x256xf32>, vector<256x32xf32>, vector<8x32xf32> -> vector<8x32xf32>
    %c0_5 = arith.constant 0 : index
    %c0_6 = arith.constant 0 : index
    %4 = vector.load %arg11[%c0_5, %c0_6] : memref<1x744xf32, #tpu.memory_space<vmem>>, vector<1x32xf32>
    %5 = vector.broadcast %4 : vector<1x32xf32> to vector<8x32xf32>
    %6 = arith.addf %3, %5 : vector<8x32xf32>
    %cst_7 = arith.constant 0.000000e+00 : f32
    %7 = vector.broadcast %cst_7 : f32 to vector<8x32xf32>
    %8 = arith.maximumf %6, %7 : vector<8x32xf32>
    %c0_8 = arith.constant 0 : index
    %c0_9 = arith.constant 0 : index
    %9 = vector.load %arg8[%c0_8, %c0_9] : memref<32x584xf32, #tpu.memory_space<vmem>>, vector<32x8xf32>
    %cst_10 = arith.constant dense<0.000000e+00> : vector<8x8xf32>
    %10 = tpu.matmul %8, %9, %cst_10 {dimension_numbers = #tpu.dot_dimension_numbers<[1], [0], [0], [1], [0, 0, 1, 1], [], []>} : vector<8x32xf32>, vector<32x8xf32>, vector<8x8xf32> -> vector<8x8xf32>
    %c0_11 = arith.constant 0 : index
    %c32 = arith.constant 32 : index
    %11 = vector.load %arg11[%c0_11, %c32] : memref<1x744xf32, #tpu.memory_space<vmem>>, vector<1x8xf32>
    %12 = vector.broadcast %11 : vector<1x8xf32> to vector<8x8xf32>
    %13 = arith.addf %10, %12 : vector<8x8xf32>
    %c0_12 = arith.constant 0 : index
    %c0_13 = arith.constant 0 : index
    %14 = vector.load %arg6[%c0_12, %c0_13] : memref<22x256xf32, #tpu.memory_space<vmem>>, vector<22x256xf32>
    %cst_14 = arith.constant dense<0.000000e+00> : vector<8x256xf32>
    %15 = tpu.matmul %0, %14, %cst_14 {dimension_numbers = #tpu.dot_dimension_numbers<[1], [0], [0], [1], [0, 0, 1, 1], [], []>} : vector<8x22xf32>, vector<22x256xf32>, vector<8x256xf32> -> vector<8x256xf32>
    %c0_15 = arith.constant 0 : index
    %c0_16 = arith.constant 0 : index
    %16 = vector.load %arg7[%c0_15, %c0_16] : memref<8x384xf32, #tpu.memory_space<vmem>>, vector<8x256xf32>
    %cst_17 = arith.constant dense<0.000000e+00> : vector<8x256xf32>
    %17 = tpu.matmul %13, %16, %cst_17 {dimension_numbers = #tpu.dot_dimension_numbers<[1], [0], [0], [1], [0, 0, 1, 1], [], []>} : vector<8x8xf32>, vector<8x256xf32>, vector<8x256xf32> -> vector<8x256xf32>
    %18 = arith.addf %15, %17 : vector<8x256xf32>
    %19 = vector.extract_strided_slice %0 {offsets = [0, 0], sizes = [8, 4], strides = [1, 1]} : vector<8x22xf32> to vector<8x4xf32>
    %c0_18 = arith.constant 0 : index
    %c192 = arith.constant 192 : index
    %20 = vector.load %arg9[%c0_18, %c192] : memref<4x224xf32, #tpu.memory_space<vmem>>, vector<4x32xf32>
    %cst_19 = arith.constant dense<0.000000e+00> : vector<8x32xf32>
    %21 = tpu.matmul %19, %20, %cst_19 {dimension_numbers = #tpu.dot_dimension_numbers<[1], [0], [0], [1], [0, 0, 1, 1], [], []>} : vector<8x4xf32>, vector<4x32xf32>, vector<8x32xf32> -> vector<8x32xf32>
    %22 = vector.extract_strided_slice %18 {offsets = [0, 0], sizes = [8, 32], strides = [1, 1]} : vector<8x256xf32> to vector<8x32xf32>
    %cst_20 = arith.constant 0.000000e+00 : f32
    %23 = vector.broadcast %cst_20 : f32 to vector<8x32xf32>
    %24 = arith.maximumf %22, %23 : vector<8x32xf32>
    %c0_21 = arith.constant 0 : index
    %c8 = arith.constant 8 : index
    %25 = vector.load %arg8[%c0_21, %c8] : memref<32x584xf32, #tpu.memory_space<vmem>>, vector<32x32xf32>
    %cst_22 = arith.constant dense<0.000000e+00> : vector<8x32xf32>
    %26 = tpu.matmul %24, %25, %cst_22 {dimension_numbers = #tpu.dot_dimension_numbers<[1], [0], [0], [1], [0, 0, 1, 1], [], []>} : vector<8x32xf32>, vector<32x32xf32>, vector<8x32xf32> -> vector<8x32xf32>
    %c0_23 = arith.constant 0 : index
    %c40 = arith.constant 40 : index
    %27 = vector.load %arg11[%c0_23, %c40] : memref<1x744xf32, #tpu.memory_space<vmem>>, vector<1x32xf32>
    %28 = vector.broadcast %27 : vector<1x32xf32> to vector<8x32xf32>
    %29 = arith.addf %26, %28 : vector<8x32xf32>
    %cst_24 = arith.constant 0.000000e+00 : f32
    %30 = vector.broadcast %cst_24 : f32 to vector<8x32xf32>
    %31 = arith.maximumf %29, %30 : vector<8x32xf32>
    %c0_25 = arith.constant 0 : index
    %c40_26 = arith.constant 40 : index
    %32 = vector.load %arg8[%c0_25, %c40_26] : memref<32x584xf32, #tpu.memory_space<vmem>>, vector<32x16xf32>
    %cst_27 = arith.constant dense<0.000000e+00> : vector<8x16xf32>
    %33 = tpu.matmul %31, %32, %cst_27 {dimension_numbers = #tpu.dot_dimension_numbers<[1], [0], [0], [1], [0, 0, 1, 1], [], []>} : vector<8x32xf32>, vector<32x16xf32>, vector<8x16xf32> -> vector<8x16xf32>
    %c0_28 = arith.constant 0 : index
    %c72 = arith.constant 72 : index
    %34 = vector.load %arg11[%c0_28, %c72] : memref<1x744xf32, #tpu.memory_space<vmem>>, vector<1x16xf32>
    %35 = vector.broadcast %34 : vector<1x16xf32> to vector<8x16xf32>
    %36 = arith.addf %33, %35 : vector<8x16xf32>
    %37 = vector.extract_strided_slice %36 {offsets = [0, 0], sizes = [8, 8], strides = [1, 1]} : vector<8x16xf32> to vector<8x8xf32>
    %38 = vector.extract_strided_slice %36 {offsets = [0, 8], sizes = [8, 8], strides = [1, 1]} : vector<8x16xf32> to vector<8x8xf32>
    %c0_29 = arith.constant 0 : index
    %c0_30 = arith.constant 0 : index
    %39 = vector.load %arg3[%c0_29, %c0_30] : memref<8x8xf32, #tpu.memory_space<vmem>>, vector<8x8xf32>
    %cst_31 = arith.constant -5.000000e-01 : f32
    %40 = vector.broadcast %cst_31 : f32 to vector<8x8xf32>
    %41 = arith.mulf %40, %39 : vector<8x8xf32>
    %42 = arith.mulf %41, %39 : vector<8x8xf32>
    %43 = arith.subf %42, %38 : vector<8x8xf32>
    %cst_32 = arith.constant dense<0.000000e+00> : vector<8xf32>
    %44 = vector.multi_reduction <add>, %43, %cst_32 [1] : vector<8x8xf32> to vector<8xf32>
    %45 = vector.shape_cast %44 : vector<8xf32> to vector<8x1xf32>
    %46 = math.exp %38 : vector<8x8xf32>
    %47 = arith.mulf %46, %39 : vector<8x8xf32>
    %48 = arith.addf %37, %47 : vector<8x8xf32>
    %49 = vector.extract_strided_slice %48 {offsets = [0, 0], sizes = [8, 4], strides = [1, 1]} : vector<8x8xf32> to vector<8x4xf32>
    %50 = vector.extract_strided_slice %48 {offsets = [0, 4], sizes = [8, 4], strides = [1, 1]} : vector<8x8xf32> to vector<8x4xf32>
    %c0_33 = arith.constant 0 : index
    %c0_34 = arith.constant 0 : index
    %51 = vector.load %arg9[%c0_33, %c0_34] : memref<4x224xf32, #tpu.memory_space<vmem>>, vector<4x32xf32>
    %cst_35 = arith.constant dense<0.000000e+00> : vector<8x32xf32>
    %52 = tpu.matmul %49, %51, %cst_35 {dimension_numbers = #tpu.dot_dimension_numbers<[1], [0], [0], [1], [0, 0, 1, 1], [], []>} : vector<8x4xf32>, vector<4x32xf32>, vector<8x32xf32> -> vector<8x32xf32>
    %53 = vector.extract_strided_slice %18 {offsets = [0, 64], sizes = [8, 32], strides = [1, 1]} : vector<8x256xf32> to vector<8x32xf32>
    %54 = arith.addf %52, %53 : vector<8x32xf32>
    %cst_36 = arith.constant 0.000000e+00 : f32
    %55 = vector.broadcast %cst_36 : f32 to vector<8x32xf32>
    %56 = arith.maximumf %54, %55 : vector<8x32xf32>
    %c0_37 = arith.constant 0 : index
    %c152 = arith.constant 152 : index
    %57 = vector.load %arg8[%c0_37, %c152] : memref<32x584xf32, #tpu.memory_space<vmem>>, vector<32x32xf32>
    %cst_38 = arith.constant dense<0.000000e+00> : vector<8x32xf32>
    %58 = tpu.matmul %56, %57, %cst_38 {dimension_numbers = #tpu.dot_dimension_numbers<[1], [0], [0], [1], [0, 0, 1, 1], [], []>} : vector<8x32xf32>, vector<32x32xf32>, vector<8x32xf32> -> vector<8x32xf32>
    %c0_39 = arith.constant 0 : index
    %c184 = arith.constant 184 : index
    %59 = vector.load %arg11[%c0_39, %c184] : memref<1x744xf32, #tpu.memory_space<vmem>>, vector<1x32xf32>
    %60 = vector.broadcast %59 : vector<1x32xf32> to vector<8x32xf32>
    %61 = arith.addf %58, %60 : vector<8x32xf32>
    %cst_40 = arith.constant 0.000000e+00 : f32
    %62 = vector.broadcast %cst_40 : f32 to vector<8x32xf32>
    %63 = arith.maximumf %61, %62 : vector<8x32xf32>
    %c0_41 = arith.constant 0 : index
    %c184_42 = arith.constant 184 : index
    %64 = vector.load %arg8[%c0_41, %c184_42] : memref<32x584xf32, #tpu.memory_space<vmem>>, vector<32x8xf32>
    %cst_43 = arith.constant dense<0.000000e+00> : vector<8x8xf32>
    %65 = tpu.matmul %56, %64, %cst_43 {dimension_numbers = #tpu.dot_dimension_numbers<[1], [0], [0], [1], [0, 0, 1, 1], [], []>} : vector<8x32xf32>, vector<32x8xf32>, vector<8x8xf32> -> vector<8x8xf32>
    %c0_44 = arith.constant 0 : index
    %c192_45 = arith.constant 192 : index
    %66 = vector.load %arg8[%c0_44, %c192_45] : memref<32x584xf32, #tpu.memory_space<vmem>>, vector<32x8xf32>
    %cst_46 = arith.constant dense<0.000000e+00> : vector<8x8xf32>
    %67 = tpu.matmul %63, %66, %cst_46 {dimension_numbers = #tpu.dot_dimension_numbers<[1], [0], [0], [1], [0, 0, 1, 1], [], []>} : vector<8x32xf32>, vector<32x8xf32>, vector<8x8xf32> -> vector<8x8xf32>
    %68 = arith.addf %65, %67 : vector<8x8xf32>
    %c0_47 = arith.constant 0 : index
    %c216 = arith.constant 216 : index
    %69 = vector.load %arg11[%c0_47, %c216] : memref<1x744xf32, #tpu.memory_space<vmem>>, vector<1x8xf32>
    %70 = vector.broadcast %69 : vector<1x8xf32> to vector<8x8xf32>
    %71 = arith.addf %68, %70 : vector<8x8xf32>
    %72 = vector.extract_strided_slice %71 {offsets = [0, 0], sizes = [8, 4], strides = [1, 1]} : vector<8x8xf32> to vector<8x4xf32>
    %73 = math.tanh %72 : vector<8x4xf32>
    %74 = math.exp %73 : vector<8x4xf32>
    %75 = arith.mulf %50, %74 : vector<8x4xf32>
    %76 = vector.extract_strided_slice %71 {offsets = [0, 4], sizes = [8, 4], strides = [1, 1]} : vector<8x8xf32> to vector<8x4xf32>
    %77 = arith.addf %75, %76 : vector<8x4xf32>
    %cst_48 = arith.constant dense<0.000000e+00> : vector<8xf32>
    %78 = vector.multi_reduction <add>, %73, %cst_48 [1] : vector<8x4xf32> to vector<8xf32>
    %79 = vector.shape_cast %78 : vector<8xf32> to vector<8x1xf32>
    %c0_49 = arith.constant 0 : index
    %c32_50 = arith.constant 32 : index
    %80 = vector.load %arg9[%c0_49, %c32_50] : memref<4x224xf32, #tpu.memory_space<vmem>>, vector<4x40xf32>
    %cst_51 = arith.constant dense<0.000000e+00> : vector<8x40xf32>
    %81 = tpu.matmul %49, %80, %cst_51 {dimension_numbers = #tpu.dot_dimension_numbers<[1], [0], [0], [1], [0, 0, 1, 1], [], []>} : vector<8x4xf32>, vector<4x40xf32>, vector<8x40xf32> -> vector<8x40xf32>
    %c0_52 = arith.constant 0 : index
    %c72_53 = arith.constant 72 : index
    %82 = vector.load %arg9[%c0_52, %c72_53] : memref<4x224xf32, #tpu.memory_space<vmem>>, vector<4x40xf32>
    %cst_54 = arith.constant dense<0.000000e+00> : vector<8x40xf32>
    %83 = tpu.matmul %77, %82, %cst_54 {dimension_numbers = #tpu.dot_dimension_numbers<[1], [0], [0], [1], [0, 0, 1, 1], [], []>} : vector<8x4xf32>, vector<4x40xf32>, vector<8x40xf32> -> vector<8x40xf32>
    %84 = arith.addf %81, %83 : vector<8x40xf32>
    %c0_55 = arith.constant 0 : index
    %c304 = arith.constant 304 : index
    %85 = vector.load %arg11[%c0_55, %c304] : memref<1x744xf32, #tpu.memory_space<vmem>>, vector<1x40xf32>
    %86 = vector.broadcast %85 : vector<1x40xf32> to vector<8x40xf32>
    %87 = arith.addf %84, %86 : vector<8x40xf32>
    %88 = vector.extract_strided_slice %87 {offsets = [0, 0], sizes = [8, 4], strides = [1, 1]} : vector<8x40xf32> to vector<8x4xf32>
    %89 = vector.extract_strided_slice %87 {offsets = [0, 4], sizes = [8, 4], strides = [1, 1]} : vector<8x40xf32> to vector<8x4xf32>
    %90 = vector.extract_strided_slice %87 {offsets = [0, 8], sizes = [8, 32], strides = [1, 1]} : vector<8x40xf32> to vector<8x32xf32>
    %91 = vector.extract_strided_slice %18 {offsets = [0, 96], sizes = [8, 32], strides = [1, 1]} : vector<8x256xf32> to vector<8x32xf32>
    %92 = arith.addf %90, %91 : vector<8x32xf32>
    %cst_56 = arith.constant 0.000000e+00 : f32
    %93 = vector.broadcast %cst_56 : f32 to vector<8x32xf32>
    %94 = arith.maximumf %92, %93 : vector<8x32xf32>
    %c0_57 = arith.constant 0 : index
    %c200 = arith.constant 200 : index
    %95 = vector.load %arg8[%c0_57, %c200] : memref<32x584xf32, #tpu.memory_space<vmem>>, vector<32x32xf32>
    %cst_58 = arith.constant dense<0.000000e+00> : vector<8x32xf32>
    %96 = tpu.matmul %94, %95, %cst_58 {dimension_numbers = #tpu.dot_dimension_numbers<[1], [0], [0], [1], [0, 0, 1, 1], [], []>} : vector<8x32xf32>, vector<32x32xf32>, vector<8x32xf32> -> vector<8x32xf32>
    %c0_59 = arith.constant 0 : index
    %c224 = arith.constant 224 : index
    %97 = vector.load %arg11[%c0_59, %c224] : memref<1x744xf32, #tpu.memory_space<vmem>>, vector<1x32xf32>
    %98 = vector.broadcast %97 : vector<1x32xf32> to vector<8x32xf32>
    %99 = arith.addf %96, %98 : vector<8x32xf32>
    %cst_60 = arith.constant 0.000000e+00 : f32
    %100 = vector.broadcast %cst_60 : f32 to vector<8x32xf32>
    %101 = arith.maximumf %99, %100 : vector<8x32xf32>
    %c0_61 = arith.constant 0 : index
    %c232 = arith.constant 232 : index
    %102 = vector.load %arg8[%c0_61, %c232] : memref<32x584xf32, #tpu.memory_space<vmem>>, vector<32x8xf32>
    %cst_62 = arith.constant dense<0.000000e+00> : vector<8x8xf32>
    %103 = tpu.matmul %94, %102, %cst_62 {dimension_numbers = #tpu.dot_dimension_numbers<[1], [0], [0], [1], [0, 0, 1, 1], [], []>} : vector<8x32xf32>, vector<32x8xf32>, vector<8x8xf32> -> vector<8x8xf32>
    %c0_63 = arith.constant 0 : index
    %c240 = arith.constant 240 : index
    %104 = vector.load %arg8[%c0_63, %c240] : memref<32x584xf32, #tpu.memory_space<vmem>>, vector<32x8xf32>
    %cst_64 = arith.constant dense<0.000000e+00> : vector<8x8xf32>
    %105 = tpu.matmul %101, %104, %cst_64 {dimension_numbers = #tpu.dot_dimension_numbers<[1], [0], [0], [1], [0, 0, 1, 1], [], []>} : vector<8x32xf32>, vector<32x8xf32>, vector<8x8xf32> -> vector<8x8xf32>
    %106 = arith.addf %103, %105 : vector<8x8xf32>
    %c0_65 = arith.constant 0 : index
    %c256 = arith.constant 256 : index
    %107 = vector.load %arg11[%c0_65, %c256] : memref<1x744xf32, #tpu.memory_space<vmem>>, vector<1x8xf32>
    %108 = vector.broadcast %107 : vector<1x8xf32> to vector<8x8xf32>
    %109 = arith.addf %106, %108 : vector<8x8xf32>
    %110 = vector.extract_strided_slice %109 {offsets = [0, 0], sizes = [8, 4], strides = [1, 1]} : vector<8x8xf32> to vector<8x4xf32>
    %111 = math.tanh %110 : vector<8x4xf32>
    %112 = math.exp %111 : vector<8x4xf32>
    %113 = arith.mulf %89, %112 : vector<8x4xf32>
    %114 = vector.extract_strided_slice %109 {offsets = [0, 4], sizes = [8, 4], strides = [1, 1]} : vector<8x8xf32> to vector<8x4xf32>
    %115 = arith.addf %113, %114 : vector<8x4xf32>
    %cst_66 = arith.constant dense<0.000000e+00> : vector<8xf32>
    %116 = vector.multi_reduction <add>, %111, %cst_66 [1] : vector<8x4xf32> to vector<8xf32>
    %117 = vector.shape_cast %116 : vector<8xf32> to vector<8x1xf32>
    %118 = arith.addf %79, %117 : vector<8x1xf32>
    %c0_67 = arith.constant 0 : index
    %c112 = arith.constant 112 : index
    %119 = vector.load %arg9[%c0_67, %c112] : memref<4x224xf32, #tpu.memory_space<vmem>>, vector<4x40xf32>
    %cst_68 = arith.constant dense<0.000000e+00> : vector<8x40xf32>
    %120 = tpu.matmul %88, %119, %cst_68 {dimension_numbers = #tpu.dot_dimension_numbers<[1], [0], [0], [1], [0, 0, 1, 1], [], []>} : vector<8x4xf32>, vector<4x40xf32>, vector<8x40xf32> -> vector<8x40xf32>
    %c0_69 = arith.constant 0 : index
    %c152_70 = arith.constant 152 : index
    %121 = vector.load %arg9[%c0_69, %c152_70] : memref<4x224xf32, #tpu.memory_space<vmem>>, vector<4x40xf32>
    %cst_71 = arith.constant dense<0.000000e+00> : vector<8x40xf32>
    %122 = tpu.matmul %115, %121, %cst_71 {dimension_numbers = #tpu.dot_dimension_numbers<[1], [0], [0], [1], [0, 0, 1, 1], [], []>} : vector<8x4xf32>, vector<4x40xf32>, vector<8x40xf32> -> vector<8x40xf32>
    %123 = arith.addf %120, %122 : vector<8x40xf32>
    %c0_72 = arith.constant 0 : index
    %c344 = arith.constant 344 : index
    %124 = vector.load %arg11[%c0_72, %c344] : memref<1x744xf32, #tpu.memory_space<vmem>>, vector<1x40xf32>
    %125 = vector.broadcast %124 : vector<1x40xf32> to vector<8x40xf32>
    %126 = arith.addf %123, %125 : vector<8x40xf32>
    %127 = vector.extract_strided_slice %126 {offsets = [0, 0], sizes = [8, 4], strides = [1, 1]} : vector<8x40xf32> to vector<8x4xf32>
    %128 = vector.extract_strided_slice %126 {offsets = [0, 4], sizes = [8, 4], strides = [1, 1]} : vector<8x40xf32> to vector<8x4xf32>
    %129 = vector.extract_strided_slice %126 {offsets = [0, 8], sizes = [8, 32], strides = [1, 1]} : vector<8x40xf32> to vector<8x32xf32>
    %130 = vector.extract_strided_slice %18 {offsets = [0, 128], sizes = [8, 32], strides = [1, 1]} : vector<8x256xf32> to vector<8x32xf32>
    %131 = arith.addf %129, %130 : vector<8x32xf32>
    %cst_73 = arith.constant 0.000000e+00 : f32
    %132 = vector.broadcast %cst_73 : f32 to vector<8x32xf32>
    %133 = arith.maximumf %131, %132 : vector<8x32xf32>
    %c0_74 = arith.constant 0 : index
    %c248 = arith.constant 248 : index
    %134 = vector.load %arg8[%c0_74, %c248] : memref<32x584xf32, #tpu.memory_space<vmem>>, vector<32x32xf32>
    %cst_75 = arith.constant dense<0.000000e+00> : vector<8x32xf32>
    %135 = tpu.matmul %133, %134, %cst_75 {dimension_numbers = #tpu.dot_dimension_numbers<[1], [0], [0], [1], [0, 0, 1, 1], [], []>} : vector<8x32xf32>, vector<32x32xf32>, vector<8x32xf32> -> vector<8x32xf32>
    %c0_76 = arith.constant 0 : index
    %c264 = arith.constant 264 : index
    %136 = vector.load %arg11[%c0_76, %c264] : memref<1x744xf32, #tpu.memory_space<vmem>>, vector<1x32xf32>
    %137 = vector.broadcast %136 : vector<1x32xf32> to vector<8x32xf32>
    %138 = arith.addf %135, %137 : vector<8x32xf32>
    %cst_77 = arith.constant 0.000000e+00 : f32
    %139 = vector.broadcast %cst_77 : f32 to vector<8x32xf32>
    %140 = arith.maximumf %138, %139 : vector<8x32xf32>
    %c0_78 = arith.constant 0 : index
    %c280 = arith.constant 280 : index
    %141 = vector.load %arg8[%c0_78, %c280] : memref<32x584xf32, #tpu.memory_space<vmem>>, vector<32x8xf32>
    %cst_79 = arith.constant dense<0.000000e+00> : vector<8x8xf32>
    %142 = tpu.matmul %133, %141, %cst_79 {dimension_numbers = #tpu.dot_dimension_numbers<[1], [0], [0], [1], [0, 0, 1, 1], [], []>} : vector<8x32xf32>, vector<32x8xf32>, vector<8x8xf32> -> vector<8x8xf32>
    %c0_80 = arith.constant 0 : index
    %c288 = arith.constant 288 : index
    %143 = vector.load %arg8[%c0_80, %c288] : memref<32x584xf32, #tpu.memory_space<vmem>>, vector<32x8xf32>
    %cst_81 = arith.constant dense<0.000000e+00> : vector<8x8xf32>
    %144 = tpu.matmul %140, %143, %cst_81 {dimension_numbers = #tpu.dot_dimension_numbers<[1], [0], [0], [1], [0, 0, 1, 1], [], []>} : vector<8x32xf32>, vector<32x8xf32>, vector<8x8xf32> -> vector<8x8xf32>
    %145 = arith.addf %142, %144 : vector<8x8xf32>
    %c0_82 = arith.constant 0 : index
    %c296 = arith.constant 296 : index
    %146 = vector.load %arg11[%c0_82, %c296] : memref<1x744xf32, #tpu.memory_space<vmem>>, vector<1x8xf32>
    %147 = vector.broadcast %146 : vector<1x8xf32> to vector<8x8xf32>
    %148 = arith.addf %145, %147 : vector<8x8xf32>
    %149 = vector.extract_strided_slice %148 {offsets = [0, 0], sizes = [8, 4], strides = [1, 1]} : vector<8x8xf32> to vector<8x4xf32>
    %150 = math.tanh %149 : vector<8x4xf32>
    %151 = math.exp %150 : vector<8x4xf32>
    %152 = arith.mulf %128, %151 : vector<8x4xf32>
    %153 = vector.extract_strided_slice %148 {offsets = [0, 4], sizes = [8, 4], strides = [1, 1]} : vector<8x8xf32> to vector<8x4xf32>
    %154 = arith.addf %152, %153 : vector<8x4xf32>
    %cst_83 = arith.constant dense<0.000000e+00> : vector<8xf32>
    %155 = vector.multi_reduction <add>, %150, %cst_83 [1] : vector<8x4xf32> to vector<8xf32>
    %156 = vector.shape_cast %155 : vector<8xf32> to vector<8x1xf32>
    %157 = arith.addf %118, %156 : vector<8x1xf32>
    %158 = arith.subf %45, %157 : vector<8x1xf32>
    %cst_84 = arith.constant 0.000000e+00 : f32
    %159 = vector.broadcast %cst_84 : f32 to vector<8x4xf32>
    %160 = arith.cmpf ogt, %127, %159 : vector<8x4xf32>
    %161 = arith.extui %160 : vector<8x4xi1> to vector<8x4xi32>
    %162 = arith.sitofp %161 : vector<8x4xi32> to vector<8x4xf32>
    %cst_85 = arith.constant 2.000000e+00 : f32
    %163 = vector.broadcast %cst_85 : f32 to vector<8x4xf32>
    %164 = arith.mulf %162, %163 : vector<8x4xf32>
    %cst_86 = arith.constant 1.000000e+00 : f32
    %165 = vector.broadcast %cst_86 : f32 to vector<8x4xf32>
    %166 = arith.subf %164, %165 : vector<8x4xf32>
    %cst_87 = arith.constant 0.000000e+00 : f32
    %167 = vector.broadcast %cst_87 : f32 to vector<8x4xf32>
    %168 = arith.cmpf ogt, %154, %167 : vector<8x4xf32>
    %169 = arith.extui %168 : vector<8x4xi1> to vector<8x4xi32>
    %170 = arith.sitofp %169 : vector<8x4xi32> to vector<8x4xf32>
    %cst_88 = arith.constant 2.000000e+00 : f32
    %171 = vector.broadcast %cst_88 : f32 to vector<8x4xf32>
    %172 = arith.mulf %170, %171 : vector<8x4xf32>
    %cst_89 = arith.constant 1.000000e+00 : f32
    %173 = vector.broadcast %cst_89 : f32 to vector<8x4xf32>
    %174 = arith.subf %172, %173 : vector<8x4xf32>
    %c0_90 = arith.constant 0 : index
    %c256_91 = arith.constant 256 : index
    %175 = vector.load %arg7[%c0_90, %c256_91] : memref<8x384xf32, #tpu.memory_space<vmem>>, vector<8x128xf32>
    %176 = vector.extract_strided_slice %175 {offsets = [0, 0], sizes = [4, 128], strides = [1, 1]} : vector<8x128xf32> to vector<4x128xf32>
    %cst_92 = arith.constant dense<0.000000e+00> : vector<8x128xf32>
    %177 = tpu.matmul %166, %176, %cst_92 {dimension_numbers = #tpu.dot_dimension_numbers<[1], [0], [0], [1], [0, 0, 1, 1], [], []>} : vector<8x4xf32>, vector<4x128xf32>, vector<8x128xf32> -> vector<8x128xf32>
    %178 = vector.extract_strided_slice %175 {offsets = [4, 0], sizes = [4, 128], strides = [1, 1]} : vector<8x128xf32> to vector<4x128xf32>
    %cst_93 = arith.constant dense<0.000000e+00> : vector<8x128xf32>
    %179 = tpu.matmul %174, %178, %cst_93 {dimension_numbers = #tpu.dot_dimension_numbers<[1], [0], [0], [1], [0, 0, 1, 1], [], []>} : vector<8x4xf32>, vector<4x128xf32>, vector<8x128xf32> -> vector<8x128xf32>
    %180 = arith.addf %177, %179 : vector<8x128xf32>
    %181 = vector.extract_strided_slice %18 {offsets = [0, 32], sizes = [8, 32], strides = [1, 1]} : vector<8x256xf32> to vector<8x32xf32>
    %182 = vector.extract_strided_slice %180 {offsets = [0, 0], sizes = [8, 32], strides = [1, 1]} : vector<8x128xf32> to vector<8x32xf32>
    %183 = arith.addf %181, %182 : vector<8x32xf32>
    %cst_94 = arith.constant 0.000000e+00 : f32
    %184 = vector.broadcast %cst_94 : f32 to vector<8x32xf32>
    %185 = arith.maximumf %183, %184 : vector<8x32xf32>
    %c0_95 = arith.constant 0 : index
    %c56 = arith.constant 56 : index
    %186 = vector.load %arg8[%c0_95, %c56] : memref<32x584xf32, #tpu.memory_space<vmem>>, vector<32x32xf32>
    %cst_96 = arith.constant dense<0.000000e+00> : vector<8x32xf32>
    %187 = tpu.matmul %185, %186, %cst_96 {dimension_numbers = #tpu.dot_dimension_numbers<[1], [0], [0], [1], [0, 0, 1, 1], [], []>} : vector<8x32xf32>, vector<32x32xf32>, vector<8x32xf32> -> vector<8x32xf32>
    %c0_97 = arith.constant 0 : index
    %c88 = arith.constant 88 : index
    %188 = vector.load %arg11[%c0_97, %c88] : memref<1x744xf32, #tpu.memory_space<vmem>>, vector<1x32xf32>
    %189 = vector.broadcast %188 : vector<1x32xf32> to vector<8x32xf32>
    %190 = arith.addf %187, %189 : vector<8x32xf32>
    %cst_98 = arith.constant 0.000000e+00 : f32
    %191 = vector.broadcast %cst_98 : f32 to vector<8x32xf32>
    %192 = arith.maximumf %190, %191 : vector<8x32xf32>
    %c0_99 = arith.constant 0 : index
    %c88_100 = arith.constant 88 : index
    %193 = vector.load %arg8[%c0_99, %c88_100] : memref<32x584xf32, #tpu.memory_space<vmem>>, vector<32x64xf32>
    %cst_101 = arith.constant dense<0.000000e+00> : vector<8x64xf32>
    %194 = tpu.matmul %192, %193, %cst_101 {dimension_numbers = #tpu.dot_dimension_numbers<[1], [0], [0], [1], [0, 0, 1, 1], [], []>} : vector<8x32xf32>, vector<32x64xf32>, vector<8x64xf32> -> vector<8x64xf32>
    %c0_102 = arith.constant 0 : index
    %c120 = arith.constant 120 : index
    %195 = vector.load %arg11[%c0_102, %c120] : memref<1x744xf32, #tpu.memory_space<vmem>>, vector<1x64xf32>
    %196 = vector.broadcast %195 : vector<1x64xf32> to vector<8x64xf32>
    %197 = arith.addf %194, %196 : vector<8x64xf32>
    %198 = vector.extract_strided_slice %197 {offsets = [0, 0], sizes = [8, 32], strides = [1, 1]} : vector<8x64xf32> to vector<8x32xf32>
    %199 = vector.extract_strided_slice %197 {offsets = [0, 32], sizes = [8, 32], strides = [1, 1]} : vector<8x64xf32> to vector<8x32xf32>
    %c0_103 = arith.constant 0 : index
    %c0_104 = arith.constant 0 : index
    %200 = vector.load %arg4[%c0_103, %c0_104] : memref<8x32xf32, #tpu.memory_space<vmem>>, vector<8x32xf32>
    %cst_105 = arith.constant -5.000000e-01 : f32
    %201 = vector.broadcast %cst_105 : f32 to vector<8x32xf32>
    %202 = arith.mulf %201, %200 : vector<8x32xf32>
    %203 = arith.mulf %202, %200 : vector<8x32xf32>
    %204 = arith.subf %203, %199 : vector<8x32xf32>
    %cst_106 = arith.constant dense<0.000000e+00> : vector<8xf32>
    %205 = vector.multi_reduction <add>, %204, %cst_106 [1] : vector<8x32xf32> to vector<8xf32>
    %206 = vector.shape_cast %205 : vector<8xf32> to vector<8x1xf32>
    %207 = arith.addf %158, %206 : vector<8x1xf32>
    %208 = math.exp %199 : vector<8x32xf32>
    %209 = arith.mulf %208, %200 : vector<8x32xf32>
    %210 = arith.addf %198, %209 : vector<8x32xf32>
    %211 = vector.extract_strided_slice %210 {offsets = [0, 0], sizes = [8, 16], strides = [1, 1]} : vector<8x32xf32> to vector<8x16xf32>
    %212 = vector.extract_strided_slice %210 {offsets = [0, 16], sizes = [8, 16], strides = [1, 1]} : vector<8x32xf32> to vector<8x16xf32>
    %c0_107 = arith.constant 0 : index
    %c0_108 = arith.constant 0 : index
    %213 = vector.load %arg10[%c0_107, %c0_108] : memref<16x352xf32, #tpu.memory_space<vmem>>, vector<16x32xf32>
    %cst_109 = arith.constant dense<0.000000e+00> : vector<8x32xf32>
    %214 = tpu.matmul %211, %213, %cst_109 {dimension_numbers = #tpu.dot_dimension_numbers<[1], [0], [0], [1], [0, 0, 1, 1], [], []>} : vector<8x16xf32>, vector<16x32xf32>, vector<8x32xf32> -> vector<8x32xf32>
    %215 = vector.extract_strided_slice %18 {offsets = [0, 160], sizes = [8, 32], strides = [1, 1]} : vector<8x256xf32> to vector<8x32xf32>
    %216 = vector.extract_strided_slice %180 {offsets = [0, 32], sizes = [8, 32], strides = [1, 1]} : vector<8x128xf32> to vector<8x32xf32>
    %217 = arith.addf %215, %216 : vector<8x32xf32>
    %218 = arith.addf %214, %217 : vector<8x32xf32>
    %cst_110 = arith.constant 0.000000e+00 : f32
    %219 = vector.broadcast %cst_110 : f32 to vector<8x32xf32>
    %220 = arith.maximumf %218, %219 : vector<8x32xf32>
    %c0_111 = arith.constant 0 : index
    %c296_112 = arith.constant 296 : index
    %221 = vector.load %arg8[%c0_111, %c296_112] : memref<32x584xf32, #tpu.memory_space<vmem>>, vector<32x32xf32>
    %cst_113 = arith.constant dense<0.000000e+00> : vector<8x32xf32>
    %222 = tpu.matmul %220, %221, %cst_113 {dimension_numbers = #tpu.dot_dimension_numbers<[1], [0], [0], [1], [0, 0, 1, 1], [], []>} : vector<8x32xf32>, vector<32x32xf32>, vector<8x32xf32> -> vector<8x32xf32>
    %c0_114 = arith.constant 0 : index
    %c384 = arith.constant 384 : index
    %223 = vector.load %arg11[%c0_114, %c384] : memref<1x744xf32, #tpu.memory_space<vmem>>, vector<1x32xf32>
    %224 = vector.broadcast %223 : vector<1x32xf32> to vector<8x32xf32>
    %225 = arith.addf %222, %224 : vector<8x32xf32>
    %cst_115 = arith.constant 0.000000e+00 : f32
    %226 = vector.broadcast %cst_115 : f32 to vector<8x32xf32>
    %227 = arith.maximumf %225, %226 : vector<8x32xf32>
    %c0_116 = arith.constant 0 : index
    %c328 = arith.constant 328 : index
    %228 = vector.load %arg8[%c0_116, %c328] : memref<32x584xf32, #tpu.memory_space<vmem>>, vector<32x32xf32>
    %cst_117 = arith.constant dense<0.000000e+00> : vector<8x32xf32>
    %229 = tpu.matmul %220, %228, %cst_117 {dimension_numbers = #tpu.dot_dimension_numbers<[1], [0], [0], [1], [0, 0, 1, 1], [], []>} : vector<8x32xf32>, vector<32x32xf32>, vector<8x32xf32> -> vector<8x32xf32>
    %c0_118 = arith.constant 0 : index
    %c360 = arith.constant 360 : index
    %230 = vector.load %arg8[%c0_118, %c360] : memref<32x584xf32, #tpu.memory_space<vmem>>, vector<32x32xf32>
    %cst_119 = arith.constant dense<0.000000e+00> : vector<8x32xf32>
    %231 = tpu.matmul %227, %230, %cst_119 {dimension_numbers = #tpu.dot_dimension_numbers<[1], [0], [0], [1], [0, 0, 1, 1], [], []>} : vector<8x32xf32>, vector<32x32xf32>, vector<8x32xf32> -> vector<8x32xf32>
    %232 = arith.addf %229, %231 : vector<8x32xf32>
    %c0_120 = arith.constant 0 : index
    %c416 = arith.constant 416 : index
    %233 = vector.load %arg11[%c0_120, %c416] : memref<1x744xf32, #tpu.memory_space<vmem>>, vector<1x32xf32>
    %234 = vector.broadcast %233 : vector<1x32xf32> to vector<8x32xf32>
    %235 = arith.addf %232, %234 : vector<8x32xf32>
    %236 = vector.extract_strided_slice %235 {offsets = [0, 0], sizes = [8, 16], strides = [1, 1]} : vector<8x32xf32> to vector<8x16xf32>
    %237 = math.tanh %236 : vector<8x16xf32>
    %238 = math.exp %237 : vector<8x16xf32>
    %239 = arith.mulf %212, %238 : vector<8x16xf32>
    %240 = vector.extract_strided_slice %235 {offsets = [0, 16], sizes = [8, 16], strides = [1, 1]} : vector<8x32xf32> to vector<8x16xf32>
    %241 = arith.addf %239, %240 : vector<8x16xf32>
    %cst_121 = arith.constant dense<0.000000e+00> : vector<8xf32>
    %242 = vector.multi_reduction <add>, %237, %cst_121 [1] : vector<8x16xf32> to vector<8xf32>
    %243 = vector.shape_cast %242 : vector<8xf32> to vector<8x1xf32>
    %c0_122 = arith.constant 0 : index
    %c32_123 = arith.constant 32 : index
    %244 = vector.load %arg10[%c0_122, %c32_123] : memref<16x352xf32, #tpu.memory_space<vmem>>, vector<16x64xf32>
    %cst_124 = arith.constant dense<0.000000e+00> : vector<8x64xf32>
    %245 = tpu.matmul %211, %244, %cst_124 {dimension_numbers = #tpu.dot_dimension_numbers<[1], [0], [0], [1], [0, 0, 1, 1], [], []>} : vector<8x16xf32>, vector<16x64xf32>, vector<8x64xf32> -> vector<8x64xf32>
    %c0_125 = arith.constant 0 : index
    %c96 = arith.constant 96 : index
    %246 = vector.load %arg10[%c0_125, %c96] : memref<16x352xf32, #tpu.memory_space<vmem>>, vector<16x64xf32>
    %cst_126 = arith.constant dense<0.000000e+00> : vector<8x64xf32>
    %247 = tpu.matmul %241, %246, %cst_126 {dimension_numbers = #tpu.dot_dimension_numbers<[1], [0], [0], [1], [0, 0, 1, 1], [], []>} : vector<8x16xf32>, vector<16x64xf32>, vector<8x64xf32> -> vector<8x64xf32>
    %248 = arith.addf %245, %247 : vector<8x64xf32>
    %c0_127 = arith.constant 0 : index
    %c576 = arith.constant 576 : index
    %249 = vector.load %arg11[%c0_127, %c576] : memref<1x744xf32, #tpu.memory_space<vmem>>, vector<1x64xf32>
    %250 = vector.broadcast %249 : vector<1x64xf32> to vector<8x64xf32>
    %251 = arith.addf %248, %250 : vector<8x64xf32>
    %252 = vector.extract_strided_slice %251 {offsets = [0, 0], sizes = [8, 16], strides = [1, 1]} : vector<8x64xf32> to vector<8x16xf32>
    %253 = vector.extract_strided_slice %251 {offsets = [0, 16], sizes = [8, 16], strides = [1, 1]} : vector<8x64xf32> to vector<8x16xf32>
    %254 = vector.extract_strided_slice %251 {offsets = [0, 32], sizes = [8, 32], strides = [1, 1]} : vector<8x64xf32> to vector<8x32xf32>
    %255 = vector.extract_strided_slice %18 {offsets = [0, 192], sizes = [8, 32], strides = [1, 1]} : vector<8x256xf32> to vector<8x32xf32>
    %256 = vector.extract_strided_slice %180 {offsets = [0, 64], sizes = [8, 32], strides = [1, 1]} : vector<8x128xf32> to vector<8x32xf32>
    %257 = arith.addf %255, %256 : vector<8x32xf32>
    %258 = arith.addf %254, %257 : vector<8x32xf32>
    %cst_128 = arith.constant 0.000000e+00 : f32
    %259 = vector.broadcast %cst_128 : f32 to vector<8x32xf32>
    %260 = arith.maximumf %258, %259 : vector<8x32xf32>
    %c0_129 = arith.constant 0 : index
    %c392 = arith.constant 392 : index
    %261 = vector.load %arg8[%c0_129, %c392] : memref<32x584xf32, #tpu.memory_space<vmem>>, vector<32x32xf32>
    %cst_130 = arith.constant dense<0.000000e+00> : vector<8x32xf32>
    %262 = tpu.matmul %260, %261, %cst_130 {dimension_numbers = #tpu.dot_dimension_numbers<[1], [0], [0], [1], [0, 0, 1, 1], [], []>} : vector<8x32xf32>, vector<32x32xf32>, vector<8x32xf32> -> vector<8x32xf32>
    %c0_131 = arith.constant 0 : index
    %c448 = arith.constant 448 : index
    %263 = vector.load %arg11[%c0_131, %c448] : memref<1x744xf32, #tpu.memory_space<vmem>>, vector<1x32xf32>
    %264 = vector.broadcast %263 : vector<1x32xf32> to vector<8x32xf32>
    %265 = arith.addf %262, %264 : vector<8x32xf32>
    %cst_132 = arith.constant 0.000000e+00 : f32
    %266 = vector.broadcast %cst_132 : f32 to vector<8x32xf32>
    %267 = arith.maximumf %265, %266 : vector<8x32xf32>
    %c0_133 = arith.constant 0 : index
    %c424 = arith.constant 424 : index
    %268 = vector.load %arg8[%c0_133, %c424] : memref<32x584xf32, #tpu.memory_space<vmem>>, vector<32x32xf32>
    %cst_134 = arith.constant dense<0.000000e+00> : vector<8x32xf32>
    %269 = tpu.matmul %260, %268, %cst_134 {dimension_numbers = #tpu.dot_dimension_numbers<[1], [0], [0], [1], [0, 0, 1, 1], [], []>} : vector<8x32xf32>, vector<32x32xf32>, vector<8x32xf32> -> vector<8x32xf32>
    %c0_135 = arith.constant 0 : index
    %c456 = arith.constant 456 : index
    %270 = vector.load %arg8[%c0_135, %c456] : memref<32x584xf32, #tpu.memory_space<vmem>>, vector<32x32xf32>
    %cst_136 = arith.constant dense<0.000000e+00> : vector<8x32xf32>
    %271 = tpu.matmul %267, %270, %cst_136 {dimension_numbers = #tpu.dot_dimension_numbers<[1], [0], [0], [1], [0, 0, 1, 1], [], []>} : vector<8x32xf32>, vector<32x32xf32>, vector<8x32xf32> -> vector<8x32xf32>
    %272 = arith.addf %269, %271 : vector<8x32xf32>
    %c0_137 = arith.constant 0 : index
    %c480 = arith.constant 480 : index
    %273 = vector.load %arg11[%c0_137, %c480] : memref<1x744xf32, #tpu.memory_space<vmem>>, vector<1x32xf32>
    %274 = vector.broadcast %273 : vector<1x32xf32> to vector<8x32xf32>
    %275 = arith.addf %272, %274 : vector<8x32xf32>
    %276 = vector.extract_strided_slice %275 {offsets = [0, 0], sizes = [8, 16], strides = [1, 1]} : vector<8x32xf32> to vector<8x16xf32>
    %277 = math.tanh %276 : vector<8x16xf32>
    %278 = math.exp %277 : vector<8x16xf32>
    %279 = arith.mulf %253, %278 : vector<8x16xf32>
    %280 = vector.extract_strided_slice %275 {offsets = [0, 16], sizes = [8, 16], strides = [1, 1]} : vector<8x32xf32> to vector<8x16xf32>
    %281 = arith.addf %279, %280 : vector<8x16xf32>
    %cst_138 = arith.constant dense<0.000000e+00> : vector<8xf32>
    %282 = vector.multi_reduction <add>, %277, %cst_138 [1] : vector<8x16xf32> to vector<8xf32>
    %283 = vector.shape_cast %282 : vector<8xf32> to vector<8x1xf32>
    %284 = arith.addf %243, %283 : vector<8x1xf32>
    %c0_139 = arith.constant 0 : index
    %c160 = arith.constant 160 : index
    %285 = vector.load %arg10[%c0_139, %c160] : memref<16x352xf32, #tpu.memory_space<vmem>>, vector<16x64xf32>
    %cst_140 = arith.constant dense<0.000000e+00> : vector<8x64xf32>
    %286 = tpu.matmul %252, %285, %cst_140 {dimension_numbers = #tpu.dot_dimension_numbers<[1], [0], [0], [1], [0, 0, 1, 1], [], []>} : vector<8x16xf32>, vector<16x64xf32>, vector<8x64xf32> -> vector<8x64xf32>
    %c0_141 = arith.constant 0 : index
    %c224_142 = arith.constant 224 : index
    %287 = vector.load %arg10[%c0_141, %c224_142] : memref<16x352xf32, #tpu.memory_space<vmem>>, vector<16x64xf32>
    %cst_143 = arith.constant dense<0.000000e+00> : vector<8x64xf32>
    %288 = tpu.matmul %281, %287, %cst_143 {dimension_numbers = #tpu.dot_dimension_numbers<[1], [0], [0], [1], [0, 0, 1, 1], [], []>} : vector<8x16xf32>, vector<16x64xf32>, vector<8x64xf32> -> vector<8x64xf32>
    %289 = arith.addf %286, %288 : vector<8x64xf32>
    %c0_144 = arith.constant 0 : index
    %c640 = arith.constant 640 : index
    %290 = vector.load %arg11[%c0_144, %c640] : memref<1x744xf32, #tpu.memory_space<vmem>>, vector<1x64xf32>
    %291 = vector.broadcast %290 : vector<1x64xf32> to vector<8x64xf32>
    %292 = arith.addf %289, %291 : vector<8x64xf32>
    %293 = vector.extract_strided_slice %292 {offsets = [0, 0], sizes = [8, 16], strides = [1, 1]} : vector<8x64xf32> to vector<8x16xf32>
    %294 = vector.extract_strided_slice %292 {offsets = [0, 16], sizes = [8, 16], strides = [1, 1]} : vector<8x64xf32> to vector<8x16xf32>
    %295 = vector.extract_strided_slice %292 {offsets = [0, 32], sizes = [8, 32], strides = [1, 1]} : vector<8x64xf32> to vector<8x32xf32>
    %296 = vector.extract_strided_slice %18 {offsets = [0, 224], sizes = [8, 32], strides = [1, 1]} : vector<8x256xf32> to vector<8x32xf32>
    %297 = vector.extract_strided_slice %180 {offsets = [0, 96], sizes = [8, 32], strides = [1, 1]} : vector<8x128xf32> to vector<8x32xf32>
    %298 = arith.addf %296, %297 : vector<8x32xf32>
    %299 = arith.addf %295, %298 : vector<8x32xf32>
    %cst_145 = arith.constant 0.000000e+00 : f32
    %300 = vector.broadcast %cst_145 : f32 to vector<8x32xf32>
    %301 = arith.maximumf %299, %300 : vector<8x32xf32>
    %c0_146 = arith.constant 0 : index
    %c488 = arith.constant 488 : index
    %302 = vector.load %arg8[%c0_146, %c488] : memref<32x584xf32, #tpu.memory_space<vmem>>, vector<32x32xf32>
    %cst_147 = arith.constant dense<0.000000e+00> : vector<8x32xf32>
    %303 = tpu.matmul %301, %302, %cst_147 {dimension_numbers = #tpu.dot_dimension_numbers<[1], [0], [0], [1], [0, 0, 1, 1], [], []>} : vector<8x32xf32>, vector<32x32xf32>, vector<8x32xf32> -> vector<8x32xf32>
    %c0_148 = arith.constant 0 : index
    %c512 = arith.constant 512 : index
    %304 = vector.load %arg11[%c0_148, %c512] : memref<1x744xf32, #tpu.memory_space<vmem>>, vector<1x32xf32>
    %305 = vector.broadcast %304 : vector<1x32xf32> to vector<8x32xf32>
    %306 = arith.addf %303, %305 : vector<8x32xf32>
    %cst_149 = arith.constant 0.000000e+00 : f32
    %307 = vector.broadcast %cst_149 : f32 to vector<8x32xf32>
    %308 = arith.maximumf %306, %307 : vector<8x32xf32>
    %c0_150 = arith.constant 0 : index
    %c520 = arith.constant 520 : index
    %309 = vector.load %arg8[%c0_150, %c520] : memref<32x584xf32, #tpu.memory_space<vmem>>, vector<32x32xf32>
    %cst_151 = arith.constant dense<0.000000e+00> : vector<8x32xf32>
    %310 = tpu.matmul %301, %309, %cst_151 {dimension_numbers = #tpu.dot_dimension_numbers<[1], [0], [0], [1], [0, 0, 1, 1], [], []>} : vector<8x32xf32>, vector<32x32xf32>, vector<8x32xf32> -> vector<8x32xf32>
    %c0_152 = arith.constant 0 : index
    %c552 = arith.constant 552 : index
    %311 = vector.load %arg8[%c0_152, %c552] : memref<32x584xf32, #tpu.memory_space<vmem>>, vector<32x32xf32>
    %cst_153 = arith.constant dense<0.000000e+00> : vector<8x32xf32>
    %312 = tpu.matmul %308, %311, %cst_153 {dimension_numbers = #tpu.dot_dimension_numbers<[1], [0], [0], [1], [0, 0, 1, 1], [], []>} : vector<8x32xf32>, vector<32x32xf32>, vector<8x32xf32> -> vector<8x32xf32>
    %313 = arith.addf %310, %312 : vector<8x32xf32>
    %c0_154 = arith.constant 0 : index
    %c544 = arith.constant 544 : index
    %314 = vector.load %arg11[%c0_154, %c544] : memref<1x744xf32, #tpu.memory_space<vmem>>, vector<1x32xf32>
    %315 = vector.broadcast %314 : vector<1x32xf32> to vector<8x32xf32>
    %316 = arith.addf %313, %315 : vector<8x32xf32>
    %317 = vector.extract_strided_slice %316 {offsets = [0, 0], sizes = [8, 16], strides = [1, 1]} : vector<8x32xf32> to vector<8x16xf32>
    %318 = math.tanh %317 : vector<8x16xf32>
    %319 = math.exp %318 : vector<8x16xf32>
    %320 = arith.mulf %294, %319 : vector<8x16xf32>
    %321 = vector.extract_strided_slice %316 {offsets = [0, 16], sizes = [8, 16], strides = [1, 1]} : vector<8x32xf32> to vector<8x16xf32>
    %322 = arith.addf %320, %321 : vector<8x16xf32>
    %cst_155 = arith.constant dense<0.000000e+00> : vector<8xf32>
    %323 = vector.multi_reduction <add>, %318, %cst_155 [1] : vector<8x16xf32> to vector<8xf32>
    %324 = vector.shape_cast %323 : vector<8xf32> to vector<8x1xf32>
    %325 = arith.addf %284, %324 : vector<8x1xf32>
    %326 = arith.subf %207, %325 : vector<8x1xf32>
    %c0_156 = arith.constant 0 : index
    %c736 = arith.constant 736 : index
    %327 = vector.load %arg11[%c0_156, %c736] : memref<1x744xf32, #tpu.memory_space<vmem>>, vector<1x8xf32>
    %328 = vector.extract_strided_slice %327 {offsets = [0, 0], sizes = [1, 1], strides = [1, 1]} : vector<1x8xf32> to vector<1x1xf32>
    %329 = vector.broadcast %328 : vector<1x1xf32> to vector<8x1xf32>
    %330 = arith.addf %326, %329 : vector<8x1xf32>
    %c0_157 = arith.constant 0 : index
    %c288_158 = arith.constant 288 : index
    %331 = vector.load %arg10[%c0_157, %c288_158] : memref<16x352xf32, #tpu.memory_space<vmem>>, vector<16x32xf32>
    %cst_159 = arith.constant dense<0.000000e+00> : vector<8x32xf32>
    %332 = tpu.matmul %293, %331, %cst_159 {dimension_numbers = #tpu.dot_dimension_numbers<[1], [0], [0], [1], [0, 0, 1, 1], [], []>} : vector<8x16xf32>, vector<16x32xf32>, vector<8x32xf32> -> vector<8x32xf32>
    %c0_160 = arith.constant 0 : index
    %c320 = arith.constant 320 : index
    %333 = vector.load %arg10[%c0_160, %c320] : memref<16x352xf32, #tpu.memory_space<vmem>>, vector<16x32xf32>
    %cst_161 = arith.constant dense<0.000000e+00> : vector<8x32xf32>
    %334 = tpu.matmul %322, %333, %cst_161 {dimension_numbers = #tpu.dot_dimension_numbers<[1], [0], [0], [1], [0, 0, 1, 1], [], []>} : vector<8x16xf32>, vector<16x32xf32>, vector<8x32xf32> -> vector<8x32xf32>
    %335 = arith.addf %332, %334 : vector<8x32xf32>
    %336 = arith.addf %335, %21 : vector<8x32xf32>
    %c0_162 = arith.constant 0 : index
    %c704 = arith.constant 704 : index
    %337 = vector.load %arg11[%c0_162, %c704] : memref<1x744xf32, #tpu.memory_space<vmem>>, vector<1x32xf32>
    %338 = vector.broadcast %337 : vector<1x32xf32> to vector<8x32xf32>
    %339 = arith.addf %336, %338 : vector<8x32xf32>
    %340 = vector.shape_cast %330 : vector<8x1xf32> to vector<8x1xf32>
    %341 = vector.broadcast %340 : vector<8x1xf32> to vector<8x8xf32>
    %342 = tpu.concatenate %339, %341 in 1 : vector<8x32xf32>, vector<8x8xf32> -> vector<8x40xf32>
    %c0_163 = arith.constant 0 : index
    %c0_164 = arith.constant 0 : index
    %343 = vector.load %arg12[%c0_163, %c0_164] : memref<8x40xf32, #tpu.memory_space<vmem>>, vector<8x40xf32>
    tpu.vector_store %arg12[%c0_163, %c0_164], %342 {strides = array<i32>} : memref<8x40xf32, #tpu.memory_space<vmem>>, vector<8x40xf32>,
    return
  }
  func.func @transform_0(%arg0: i32) -> (i32, i32) {
    %c0_i32 = arith.constant 0 : i32
    %c0_i32_0 = arith.constant 0 : i32
    return %arg0, %c0_i32 : i32, i32
  }
  func.func @transform_1(%arg0: i32) -> (i32, i32) {
    %c0_i32 = arith.constant 0 : i32
    %c0_i32_0 = arith.constant 0 : i32
    return %arg0, %c0_i32 : i32, i32
  }
  func.func @transform_2(%arg0: i32) -> (i32, i32) {
    %c0_i32 = arith.constant 0 : i32
    %c0_i32_0 = arith.constant 0 : i32
    return %arg0, %c0_i32 : i32, i32
  }
  func.func @transform_3(%arg0: i32) -> (i32, i32) {
    %c0_i32 = arith.constant 0 : i32
    %c0_i32_0 = arith.constant 0 : i32
    return %arg0, %c0_i32 : i32, i32
  }
  func.func @transform_4(%arg0: i32) -> (i32, i32) {
    %c0_i32 = arith.constant 0 : i32
    %c0_i32_0 = arith.constant 0 : i32
    %c0_i32_1 = arith.constant 0 : i32
    return %c0_i32, %c0_i32_0 : i32, i32
  }
  func.func @transform_5(%arg0: i32) -> (i32, i32) {
    %c0_i32 = arith.constant 0 : i32
    %c0_i32_0 = arith.constant 0 : i32
    %c0_i32_1 = arith.constant 0 : i32
    return %c0_i32, %c0_i32_0 : i32, i32
  }
  func.func @transform_6(%arg0: i32) -> (i32, i32) {
    %c0_i32 = arith.constant 0 : i32
    %c0_i32_0 = arith.constant 0 : i32
    %c0_i32_1 = arith.constant 0 : i32
    return %c0_i32, %c0_i32_0 : i32, i32
  }
  func.func @transform_7(%arg0: i32) -> (i32, i32) {
    %c0_i32 = arith.constant 0 : i32
    %c0_i32_0 = arith.constant 0 : i32
    %c0_i32_1 = arith.constant 0 : i32
    return %c0_i32, %c0_i32_0 : i32, i32
  }
  func.func @transform_8(%arg0: i32) -> (i32, i32) {
    %c0_i32 = arith.constant 0 : i32
    %c0_i32_0 = arith.constant 0 : i32
    %c0_i32_1 = arith.constant 0 : i32
    return %c0_i32, %c0_i32_0 : i32, i32
  }
  func.func @transform_9(%arg0: i32) -> (i32, i32) {
    %c0_i32 = arith.constant 0 : i32
    %c0_i32_0 = arith.constant 0 : i32
    %c0_i32_1 = arith.constant 0 : i32
    return %c0_i32, %c0_i32_0 : i32, i32
  }
  func.func @transform_10(%arg0: i32) -> (i32, i32) {
    %c0_i32 = arith.constant 0 : i32
    %c0_i32_0 = arith.constant 0 : i32
    %c0_i32_1 = arith.constant 0 : i32
    return %c0_i32, %c0_i32_0 : i32, i32
  }
  func.func @transform_11(%arg0: i32) -> (i32, i32) {
    %c0_i32 = arith.constant 0 : i32
    %c0_i32_0 = arith.constant 0 : i32
    return %arg0, %c0_i32 : i32, i32
  }
}

</mosaic_0001>

<bundles_post_ra>
// kernel: double_image_flow_forward.1
= control target key start
LH: loop header
LB: loop body
LE: loop exit
PB: predicated region body
PF: predicated region fallthrough
CT: control target
= control target key end

     0   :  { %s2338_s30 = smov 96   ;;  %vm205_vm0 = vcmask 1045504   ;;  %vm125_vm1 = vcmask 261120   ;;  %vm201_vm2 = vcmask 179200   ;;  %vm157_vm3 = vcmask 64512   ;;  %s2341_s21 = smov 8   ;;  %s3171_s4 = inlined_call_operand.vmem [shape: f32[256,32], index: 4, kind: input, shape index: {}]   ;;  %s3172_s10 = inlined_call_operand.vmem [shape: f32[1,744], index: 10, kind: input, shape index: {}]   ;;  %s3173_s1 = inlined_call_operand.vmem [shape: f32[8,256], index: 1, kind: input, shape index: {}]   ;;  %s3174_s7 = inlined_call_operand.vmem [shape: f32[32,584], index: 7, kind: input, shape index: {}]   ;;  %s3175_s5 = inlined_call_operand.vmem [shape: f32[22,256], index: 5, kind: input, shape index: {}]   ;;  %s3176_s6 = inlined_call_operand.vmem [shape: f32[8,384], index: 6, kind: input, shape index: {}]   ;;  %s3177_s0 = inlined_call_operand.vmem [shape: f32[8,22], index: 0, kind: input, shape index: {}]   ;;  %s3178_s2 = inlined_call_operand.vmem [shape: f32[8,8], index: 2, kind: input, shape index: {}]   ;;  %s3179_s8 = inlined_call_operand.vmem [shape: f32[4,224], index: 8, kind: input, shape index: {}]   ;;  %s3180_s3 = inlined_call_operand.vmem [shape: f32[8,32], index: 3, kind: input, shape index: {}]   ;;  %s3181_s9 = inlined_call_operand.vmem [shape: f32[16,352], index: 9, kind: input, shape index: {}]   ;;  %s3182_s11 = inlined_call_operand.vmem [shape: f32[8,40], index: 11, kind: output, shape index: {}]  }
   0x1   :  { %v56_v0 = vld [vmem:[%s3171_s4 + $0x78] sm:$0xff]  ;;  %v55_v1 = vld [vmem:[%s3171_s4 + $0x70] sm:$0xff]  ;;  %v54_v4 = vld [vmem:[%s3171_s4 + $0x68] sm:$0xff]  ;;  %s2342_s23 = smov 64   ;;  %s2343_s24 = smov 56   ;;  %vm261_vm4 = vcmask 1043456  }
   0x2   :  { %v72_v2 = vld [vmem:[%s3171_s4 + $0xf8] sm:$0xff]  ;;  %77 = vmatpush.msra.mxu0 %v56_v0  ;;  %v71_v3 = vld [vmem:[%s3171_s4 + $0xf0] sm:$0xff]  ;;  %v70_v5 = vld [vmem:[%s3171_s4 + $0xe8] sm:$0xff]  ;;  %vm258_vm5 = vcmask 31744   ;;  %s2344_s16 = smov 104   ;;  %s2345_s17 = smov 72  }
   0x3   :  { %97 = vmatpush.msra.mxu1 %v72_v2  ;;  %v53_v6 = vld [vmem:[%s3171_s4 + $0x60] sm:$0xff]  ;;  %v52_v8 = vld [vmem:[%s3171_s4 + $0x58] sm:$0xff]  ;;  %v51_v10 = vld [vmem:[%s3171_s4 + $0x50] sm:$0xff]  ;;  %s2346_s20 = smov 40   ;;  %s2347_s27 = smov 4   ;;  %vm806_vm6 = vcmask 130048  }
   0x4   :  { %78 = vmatpush.msra.mxu0 %v55_v1  ;;  %v69_v7 = vld [vmem:[%s3171_s4 + $0xe0] sm:$0xff]  ;;  %v68_v9 = vld [vmem:[%s3171_s4 + $0xd8] sm:$0xff]  ;;  %v67_v11 = vld [vmem:[%s3171_s4 + $0xd0] sm:$0xff]  ;;  %s2349_s28 = smov 16   ;;  %s2350_s13 = smov 80   ;;  %vm1159_vm9 = vcmask 326656  }
   0x5   :  { %98 = vmatpush.msra.mxu1 %v71_v3  ;;  %v50_v12 = vld [vmem:[%s3171_s4 + $0x48] sm:$0xff]  ;;  %v49_v14 = vld [vmem:[%s3171_s4 + $0x40] sm:$0xff]  ;;  %v48_v16 = vld [vmem:[%s3171_s4 + $0x38] sm:$0xff]  ;;  %s2352_s18 = smov 32   ;;  %vm1324_vm10 = vcmask 195584  }
   0x6   :  { %79 = vmatpush.msra.mxu0 %v54_v4  ;;  %v66_v13 = vld [vmem:[%s3171_s4 + $0xc8] sm:$0xff]  ;;  %v65_v15 = vld [vmem:[%s3171_s4 + $0xc0] sm:$0xff]  ;;  %v64_v17 = vld [vmem:[%s3171_s4 + $0xb8] sm:$0xff] }
   0x7   :  { %99 = vmatpush.msra.mxu1 %v70_v5  ;;  %v47_v18 = vld [vmem:[%s3171_s4 + $0x30] sm:$0xff]  ;;  %v46_v20 = vld [vmem:[%s3171_s4 + $0x28] sm:$0xff]  ;;  %v45_v22 = vld [vmem:[%s3171_s4 + $0x20] sm:$0xff] }
   0x8   :  { %80 = vmatpush.msra.mxu0 %v53_v6  ;;  %v63_v19 = vld [vmem:[%s3171_s4 + $0xb0] sm:$0xff]  ;;  %v62_v21 = vld [vmem:[%s3171_s4 + $0xa8] sm:$0xff]  ;;  %v61_v23 = vld [vmem:[%s3171_s4 + $0xa0] sm:$0xff] }
   0x9   :  { %100 = vmatpush.msra.mxu1 %v69_v7  ;;  %v44_v24 = vld [vmem:[%s3171_s4 + $0x18] sm:$0xff]  ;;  %v43_v26 = vld [vmem:[%s3171_s4 + $0x10] sm:$0xff]  ;;  %v42_v28 = vld [vmem:[%s3171_s4 + $0x8] sm:$0xff] }
   0xa   :  { %81 = vmatpush.msra.mxu0 %v52_v8  ;;  %v60_v25 = vld [vmem:[%s3171_s4 + $0x98] sm:$0xff]  ;;  %v59_v27 = vld [vmem:[%s3171_s4 + $0x90] sm:$0xff]  ;;  %v58_v29 = vld [vmem:[%s3171_s4 + $0x88] sm:$0xff] }
   0xb   :  { %101 = vmatpush.msra.mxu1 %v68_v9  ;;  %v41_v30 = vld [vmem:[%s3171_s4] sm:$0xff]  ;;  %v40_v33 = vld [vmem:[%s3173_s1 + $0x8] sm:$0xff]  ;;  %v2525_v35 = vld [vmem:[%s3174_s7 + $0x78] sm:$0xff] }
   0xc   :  { %82 = vmatpush.msra.mxu0 %v51_v10  ;;  %v57_v31 = vld [vmem:[%s3171_s4 + $0x80] sm:$0xff]  ;;  %141 = vmatpush.msra.mxu2 %v2525_v35  ;;  %v2531_v36 = vld [vmem:[%s3174_s7 + $0x50] sm:$0xff]  ;;  %v2537_v37 = vld [vmem:[%s3174_s7 + $0x28] sm:$0xff]  ;;  %s2339_s4 = smov 120  }
   0xd   :  { %102 = vmatpush.msra.mxu1 %v67_v11  ;;  %v39_v32 = vld [vmem:[%s3173_s1] sm:$0xff]  ;;  %v151_v40 = vld [vmem:[%s3175_s5 + $0x10] sm:$0xff]  ;;  %v156_v49 = vld [vmem:[%s3176_s6 + $0x8] sm:$0xff]  ;;  %v2572_v50 = vpack.i.bf16 %v2531_v36, %v2525_v35  ;;  %s2351_s1 = smov 24  }
   0xe   :  { %83 = vmatpush.msra.mxu0 %v50_v12  ;;  %v2299_v34 = vld [vmem:[%s3172_s10] ss:$0 sm:$0xff]  ;;  %142 = vmatpush.msra.mxu2 %v2531_v36  ;;  %v154_v56 = vld [vmem:[%s3175_s5 + $0x28] sm:$0x3f]  ;;  %v152_v57 = vld [vmem:[%s3175_s5 + $0x18] sm:$0xff] }
   0xf   :  { %103 = vmatpush.msra.mxu1 %v66_v13  ;;  %122 = vrot.lane.b32.xlu0 %v2299_v34, %s2338_s30  ;;  %v2543_v38 = vld [vmem:[%s3174_s7] sm:$0xff]  ;;  %v150_v58 = vld [vmem:[%s3175_s5 + $0x8] sm:$0xff] }
  0x10   :  { %84 = vmatpush.msra.mxu0 %v49_v14  ;;  %143 = vmatpush.msra.mxu2 %v2537_v37  ;;  %v153_v39 = vld [vmem:[%s3175_s5 + $0x20] sm:$0x3f]  ;;  %v2576_v51 = vpack.i.bf16 %v2543_v38, %v2537_v37 }
  0x11   :  { %104 = vmatpush.msra.mxu1 %v65_v15  ;;  %v149_v46 = vld [vmem:[%s3175_s5] sm:$0xff]  ;;  %s2354_s5 = smov 112  }
  0x12   :  { %85 = vmatpush.msra.mxu0 %v48_v16  ;;  %144 = vmatpush.msra.mxu2 %v2543_v38  ;;  %v155_v47 = vld [vmem:[%s3176_s6] sm:$0xff] }
  0x13   :  { %105 = vmatpush.msra.mxu1 %v64_v17  ;;  %176 = vmatpush.msra.mxu3 %v155_v47  ;;  %v2563_v48 = vld [vmem:[%s3177_s0] sm:$0xff]  ;;  %s2340_s0 = smov 88  }
  0x14   :  { %86 = vmatpush.msra.mxu0 %v47_v18  ;;  %1927 = vmatpush.msk.msrb.mxu2 %vm205_vm0, %v153_v39  ;;  %v2300_v52 = vld [vmem:[%s3172_s10] ss:$0 sm:$0xff]  ;;  %v252_v2 = vld [vmem:[%s3179_s8 + $0x4] sm:$0xf]  ;;  %v2659_v39 = vld [vmem:[%s3174_s7 + $0x30] sm:$0xff] }
  0x15   :  { %106 = vmatpush.msra.mxu1 %v63_v19  ;;  %196 = vmatpush.msrb.mxu3 %v156_v49  ;;  %v373_v59 = vld [vmem:[%s3178_s2] sm:$0xff]  ;;  %254 = vst [vmem:[#allocation1] ss:$2 sm:$0xff] %v252_v2 }
  0x16   :  { %87 = vmatpush.msra.mxu0 %v46_v20  ;;  %226 = vmatpush.msrb.mxu2 %v151_v40 }
  0x17   :  { %107 = vmatpush.msra.mxu1 %v62_v21  ;;  %1999 = vrot.lane.b32.xlu0 %v2572_v50, %s2339_s4  ;;  %v396_v21 = vld [vmem:[%s3179_s8] sm:$0xf] }
  0x18   :  { %88 = vmatpush.msra.mxu0 %v45_v22  ;;  %227 = vmatpush.msrb.mxu2 %v149_v46 }
  0x19   :  { %108 = vmatpush.msra.mxu1 %v61_v23  ;;  %2004 = vrot.lane.b32.xlu1 %v2576_v51, %s2339_s4 }
  0x1a   :  { %89 = vmatpush.msra.mxu0 %v44_v24  ;;  %2009 = vrot.lane.b32.xlu2 %v2572_v50, %s2340_s0 }
  0x1b   :  { %109 = vmatpush.msra.mxu1 %v60_v25 }
  0x1c   :  { %90 = vmatpush.msra.mxu0 %v43_v26  ;;  %v255_v3 = vld.sshfl [vmem:[#allocation1] sm:$0xff pattern:$0x75316420] }
  0x1d   :  { %110 = vmatpush.msra.mxu1 %v59_v27  ;;  %564 = vst [vmem:[#allocation1] ss:$2 sm:$0xff] %v396_v21 }
  0x1e   :  { %91 = vmatpush.msra.mxu0 %v42_v28 }
  0x1f   :  { %111 = vmatpush.msra.mxu1 %v58_v29  ;;  %2014 = vrot.lane.b32.xlu0 %v2576_v51, %s2340_s0 }
  0x20   :  { %92 = vmatpush.msra.mxu0 %v41_v30 }
  0x21   :  { %112 = vmatpush.msra.mxu1 %v57_v31  ;;  %93 = vmatmul.f32.vlgmr.msra.gmra.mxu0 %v39_v32  ;;  %v2640_v31 = vld [vmem:[%s3174_s7 + $0x58] sm:$0xff]  ;;  %v2645_v32 = vld [vmem:[%s3174_s7 + $0x80] sm:$0xff] }
  0x22   :  { %113 = vmatmul.f32.vlgmr.msra.gmra.mxu1 %v40_v33  ;;  %308 = vrot.lane.b32.xlu2 %v2300_v52, %s2340_s0  ;;  %v2650_v33 = vld [vmem:[%s3174_s7 + $0x8] sm:$0xff] }
  0x23   :  { %256 = vrot.lane.b32.xlu1 %v255_v3, %s2342_s23  ;;  %v2663_v40 = vpack.i.bf16 %v2650_v33, %v2659_v39 }
  0x24   :  { %v565_v23 = vld.sshfl [vmem:[#allocation1] sm:$0xff pattern:$0x75316420] }
  0x25   :  { %592 = vst [vmem:[#allocation1] ss:$2 sm:$0xff] %v396_v21 }
  0x2a   :  { %387 = vrot.lane.b32.xlu2 %v373_v59, %s2341_s21 }
  0x2b   :  { %347 = vrot.lane.b32.xlu1 %v2300_v52, %s2343_s24 }
  0x74   :  { %v2010_v8 = vpop.permute.xlu2 %2009 }
  0x75   :  { %v2011_v9 = vunpack.i.l.bf16 %v2010_v8  ;;  %v2012_v11 = vunpack.i.h.bf16 %v2010_v8 }
  0x7c   :  { %v309_v17 = vpop.permute.xlu2 %308 }
  0x81   :  { %v123_v53 = vpop.permute.xlu0 %122 }
  0x84   :  { %v388_v29 = vpop.permute.xlu2 %387 }
  0x89   :  { %v2000_v60 = vpop.permute.xlu0 %1999 }
  0x8a   :  { %v2002_v62 = vunpack.i.h.bf16 %v2000_v60  ;;  %v2001_v63 = vunpack.i.l.bf16 %v2000_v60 }
  0x8b   :  { %v2005_v61 = vpop.permute.xlu1 %2004 }
  0x8c   :  { %v2006_v0 = vunpack.i.l.bf16 %v2005_v61  ;;  %v2007_v1 = vunpack.i.h.bf16 %v2005_v61 }
  0x91   :  { %v2015_v10 = vpop.permute.xlu0 %2014 }
  0x92   :  { %v2016_v13 = vunpack.i.l.bf16 %v2015_v10  ;;  %v2017_v14 = vunpack.i.h.bf16 %v2015_v10  ;;  %v765_v10 = vld [vmem:[%s3179_s8 + $0x4] sm:$0xf] }
  0x95   :  { %v257_v12 = vpop.permute.xlu1 %256 }
  0x9d   :  { %v348_v24 = vpop.permute.xlu1 %347 }
  0x9e   :  { %v94_v41 = vpop.f32.mrf.mxu0 }
  0x9f   :  { %v114_v42 = vpop.f32.mrf.mxu1  ;;  %v95_v43 = vadd.f32 %v2299_v34, %v94_v41  ;;  %v2654_v34 = vpack.i.bf16 %v2640_v31, %v2645_v32 }
  0xa1   :  { %v115_v44 = vadd.f32 %v114_v42, %v95_v43  ;;  %2019 = vrot.lane.b32.xlu1 %v2654_v34, %s2344_s16 }
  0xa3   :  { %v117_v45 = vmax.f32 %v115_v44, 0.0 }
  0xa5   :  { %1924 = vmatmul.msk.f32.vlgmr.msra.gmra.mxu2 %vm125_vm1, %v117_v45 }
  0xa6   :  { %1931 = vmatpush.msk.msra.mxu2 %vm261_vm4, %v257_v12 }
  0xa9   :  { %2029 = vrot.lane.b32.xlu1 %v2654_v34, %s2345_s17 }
  0xad   :  { %1928 = vmatmul.msk.f32.vlgmr.msrb.gmra.mxu2 %vm201_vm2, %v2563_v48 }
  0xae   :  { %365 = vmatpush.msrb.mxu2 %v2011_v9  ;;  %v593_v9 = vld.sshfl [vmem:[#allocation1] sm:$0xff pattern:$0x75316420] }
  0xaf   :  { %770 = vst [vmem:[#allocation1] ss:$2 sm:$0xff] %v765_v10  ;;  %v2303_v10 = vld [vmem:[%s3172_s10 + $0x1] ss:$0 sm:$0xff] }
  0xb0   :  { %366 = vmatpush.msrb.mxu2 %v2012_v11  ;;  %v764_v11 = vld [vmem:[%s3179_s8] sm:$0xff]  ;;  %s2348_s8 = smov 124  }
  0xb2   :  { %367 = vmatpush.msrb.mxu2 %v2016_v13 }
  0xb4   :  { %368 = vmatpush.msrb.mxu2 %v2017_v14 }
  0xb5   :  { %1932 = vmatmul.msk.f32.vlgmr.msra.gmra.mxu2 %vm258_vm5, %v2563_v48 }
  0xb6   :  { %v2697_v12 = vld.sshfl [vmem:[#allocation1] sm:$0xff pattern:$0x75316420] }
  0xb7   :  { %799 = vst [vmem:[#allocation1] ss:$2 sm:$0xff] %v764_v11  ;;  %v2743_v11 = vld [vmem:[%s3176_s6 + $0x10] sm:$0xff] }
 0x113   :  { %v2020_v44 = vpop.permute.xlu1 %2019 }
 0x114   :  { %v2021_v45 = vunpack.i.l.bf16 %v2020_v44  ;;  %v2022_v47 = vunpack.i.h.bf16 %v2020_v44  ;;  %v801_v44 = vld.sshfl [vmem:[#allocation1 + $0x8] sm:$0xff pattern:$0x75316420] }
 0x116   :  { %469 = vmatpush.msrb.mxu0 %v2021_v45 }
 0x118   :  { %470 = vmatpush.msrb.mxu0 %v2022_v47 }
 0x11b   :  { %v2030_v49 = vpop.permute.xlu1 %2029 }
 0x128   :  { %v146_v54 = vpop.f32.mrf.mxu2 }
 0x129   :  { %v147_v55 = vadd.f32 %v146_v54, %v123_v53  ;;  %v2032_v53 = vunpack.i.h.bf16 %v2030_v49  ;;  %v2031_v54 = vunpack.i.l.bf16 %v2030_v49 }
 0x12b   :  { %1925 = vmatmul.msk.f32.vlgmr.msra.gmra.mxu3 %vm157_vm3, %v147_v55  ;;  %537 = vmatpush.msra.mxu2 %v2031_v54 }
 0x12c   :  { %1929 = vmatpush.msk.msra.mxu3 %vm205_vm0, %v154_v56 }
 0x12d   :  { %538 = vmatpush.msra.mxu2 %v2032_v53 }
 0x12e   :  { %246 = vmatpush.msra.mxu3 %v152_v57 }
 0x130   :  { %247 = vmatpush.msra.mxu3 %v150_v58  ;;  %v229_v4 = vpop.f32.mrf.mxu2  ;;  %v2301_v58 = vld [vmem:[%s3172_s10 + $0x1] ss:$0 sm:$0xff] }
 0x131   :  { %451 = vrot.lane.b32.xlu1 %v2301_v58, %s2345_s17 }
 0x133   :  { %1926 = vmatmul.msk.f32.vlgmr.msrb.gmra.mxu3 %vm157_vm3, %v147_v55 }
 0x134   :  { %326 = vmatpush.msrb.mxu3 %v2001_v63 }
 0x136   :  { %327 = vmatpush.msrb.mxu3 %v2002_v62 }
 0x138   :  { %328 = vmatpush.msrb.mxu3 %v2006_v0  ;;  %v2631_v22 = vpop.f32.mrf.mxu2 }
 0x13a   :  { %329 = vmatpush.msrb.mxu3 %v2007_v1 }
 0x13b   :  { %1930 = vmatmul.msk.f32.vlgmr.msra.gmra.mxu3 %vm201_vm2, %v2563_v48 }
 0x13c   :  { %1935 = vmatpush.msk.msra.mxu3 %vm261_vm4, %v396_v21 }
 0x1ae   :  { %v178_v5 = vpop.f32.mrf.mxu3 }
 0x1af   :  { %v2612_v6 = vadd.f32 %v229_v4, %v178_v5  ;;  %v452_v4 = vpop.permute.xlu1 %451 }
 0x1b1   :  { %v284_v7 = vmax.f32 %v2612_v6, 0.0  ;;  %398 = vrot.lane.b32.xlu2 %v2612_v6, %s2342_s23 }
 0x1b3   :  { %1933 = vmatmul.msk.f32.vlgmr.msrb.gmra.mxu3 %vm125_vm1, %v284_v7 }
 0x1b6   :  { %v2622_v15 = vpop.f32.mrf.mxu3 }
 0x1b9   :  { %2034 = vrot.lane.b32.xlu2 %v2663_v40, %s2345_s17 }
 0x1be   :  { %v2624_v16 = vpop.f32.mrf.mxu3 }
 0x1c1   :  { %2044 = vrot.lane.b32.xlu2 %v2663_v40, %s2342_s23 }
 0x1c9   :  { %566 = vrot.lane.b32.xlu2 %v565_v23, %s2343_s24 }
 0x20b   :  { %v399_v43 = vpop.permute.xlu2 %398 }
 0x213   :  { %v2035_v52 = vpop.permute.xlu2 %2034 }
 0x214   :  { %v2036_v55 = vunpack.i.l.bf16 %v2035_v52  ;;  %v2037_v56 = vunpack.i.h.bf16 %v2035_v52 }
 0x216   :  { %539 = vmatpush.msra.mxu2 %v2036_v55 }
 0x218   :  { %540 = vmatpush.msra.mxu2 %v2037_v56 }
 0x21b   :  { %v2045_v60 = vpop.permute.xlu2 %2044 }
 0x21c   :  { %v2046_v63 = vunpack.i.l.bf16 %v2045_v60  ;;  %v2047_v3 = vunpack.i.h.bf16 %v2045_v60 }
 0x236   :  { %v331_v18 = vpop.f32.mrf.mxu3 }
 0x237   :  { %v332_v19 = vadd.f32 %v331_v18, %v309_v17 }
 0x239   :  { %v334_v20 = vmax.f32 %v332_v19, 0.0 }
 0x23b   :  { %1934 = vmatmul.msk.f32.vlgmr.msrb.gmra.mxu2 %vm125_vm1, %v334_v20 }
 0x2be   :  { %v370_v25 = vpop.f32.mrf.mxu2 }
 0x2bf   :  { %v2633_v26 = vadd.f32 %v370_v25, %v348_v24  ;;  %v567_v24 = vpop.permute.xlu2 %566 }
 0x2c0   :  { %1940 = vmatpush.msk.msrb.mxu3 %vm261_vm4, %v567_v24 }
 0x2c1   :  { %v384_v27 = vmul.f32 1.442695, %v2633_v26 }
 0x2c3   :  { %2309 = vpow2.f32 %v384_v27 }
 0x2c9   :  { %v2310_v28 = vpop.eup %2309 }
 0x2ca   :  { %v390_v30 = vmul.f32 %v2310_v28, %v388_v29 }
 0x2cc   :  { %392 = vrot.lane.b32.xlu0 %v390_v30, %s2339_s4  ;;  %v2721_v30 = vld [vmem:[%s3172_s10 + $0x2] ss:$0 sm:$0xff] }
 0x2cd   :  { %621 = vrot.lane.b32.xlu2 %v2721_v30, %s2350_s13 }
 0x2d4   :  { %2024 = vrot.lane.b32.xlu0 %v2663_v40, %s2344_s16 }
 0x2d5   :  { %2054 = vrot.lane.b32.xlu2 %v2663_v40, %s2343_s24 }
 0x2dc   :  { %2039 = vrot.lane.b32.xlu0 %v2654_v34, %s2342_s23 }
 0x2dd   :  { %2064 = vrot.lane.b32.xlu2 %v2654_v34, %s2351_s1 }
 0x2e4   :  { %545 = vrot.lane.b32.xlu0 %v2301_v58, %s2346_s20 }
 0x2e5   :  { %2074 = vrot.lane.b32.xlu2 %v2663_v40, %s2351_s1 }
 0x2ed   :  { %804 = vrot.lane.b32.xlu2 %v801_v44, %s2349_s28 }
 0x33e   :  { %v393_v41 = vpop.permute.xlu0 %392 }
 0x33f   :  { %v2679_v42 = vadd.f32 %v393_v41, %v2633_v26 }
 0x341   :  { %1936 = vmatmul.msk.f32.vlgmr.msra.gmra.mxu3 %vm258_vm5, %v2679_v42 }
 0x346   :  { %v2025_v46 = vpop.permute.xlu0 %2024 }
 0x347   :  { %v2026_v48 = vunpack.i.l.bf16 %v2025_v46  ;;  %v2027_v57 = vunpack.i.h.bf16 %v2025_v46 }
 0x349   :  { %471 = vmatpush.msrb.mxu0 %v2026_v48 }
 0x34b   :  { %472 = vmatpush.msrb.mxu0 %v2027_v57 }
 0x34e   :  { %v2040_v59 = vpop.permute.xlu0 %2039 }
 0x34f   :  { %v2041_v61 = vunpack.i.l.bf16 %v2040_v59  ;;  %v2042_v62 = vunpack.i.h.bf16 %v2040_v59 }
 0x351   :  { %505 = vmatpush.msrb.mxu1 %v2041_v61 }
 0x353   :  { %506 = vmatpush.msrb.mxu1 %v2042_v62 }
 0x355   :  { %507 = vmatpush.msrb.mxu1 %v2046_v63 }
 0x356   :  { %v546_v17 = vpop.permute.xlu0 %545 }
 0x357   :  { %508 = vmatpush.msrb.mxu1 %v2047_v3 }
 0x3c4   :  { %v424_v0 = vpop.f32.mrf.mxu3 }
 0x3c5   :  { %v425_v1 = vadd.f32 %v424_v0, %v399_v43  ;;  %v800_v43 = vld.sshfl [vmem:[#allocation1] sm:$0xff pattern:$0x75316420] }
 0x3c7   :  { %v427_v2 = vmax.f32 %v425_v1, 0.0 }
 0x3c9   :  { %1937 = vmatmul.msk.f32.vlgmr.msrb.gmra.mxu0 %vm125_vm1, %v427_v2  ;;  %1939 = vmatmul.msk.f32.vlgmr.msra.gmra.mxu2 %vm125_vm1, %v427_v2 }
 0x446   :  { %v474_v5 = vpop.f32.mrf.mxu0 }
 0x447   :  { %v475_v7 = vadd.f32 %v474_v5, %v452_v4 }
 0x449   :  { %v477_v8 = vmax.f32 %v475_v7, 0.0 }
 0x44b   :  { %1938 = vmatmul.msk.f32.vlgmr.msrb.gmra.mxu1 %vm125_vm1, %v477_v8 }
 0x44c   :  { %v542_v13 = vpop.f32.mrf.mxu2 }
 0x4c8   :  { %v510_v14 = vpop.f32.mrf.mxu1 }
 0x4c9   :  { %v543_v18 = vadd.f32 %v542_v13, %v510_v14  ;;  %v1015_v13 = vrot.slane %v2743_v11, 4 }
 0x4cb   :  { %v548_v19 = vadd.f32 %v546_v17, %v543_v18 }
 0x4cd   :  { %2311 = vtanh.f32 %v548_v19 }
 0x4d3   :  { %v2699_v20 = vpop.eup %2311 }
 0x4d4   :  { %v550_v21 = vmul.f32 1.442695, %v2699_v20 }
 0x4d6   :  { %2313 = vpow2.f32 %v550_v21 }
 0x4dc   :  { %v2314_v23 = vpop.eup %2313 }
 0x4dd   :  { %553 = vrot.lane.b32.xlu1 %v2314_v23, %s2347_s27 }
 0x4e5   :  { %594 = vrot.lane.b32.xlu1 %v593_v9, %s2338_s30 }
 0x4ed   :  { %2049 = vrot.lane.b32.xlu1 %v2654_v34, %s2343_s24 }
 0x4f5   :  { %2059 = vrot.lane.b32.xlu1 %v2654_v34, %s2349_s28 }
 0x4fd   :  { %2069 = vrot.lane.b32.xlu1 %v2663_v40, %s2349_s28 }
 0x505   :  { %802 = vrot.lane.b32.xlu1 %v800_v43, %s2349_s28 }
 0x54f   :  { %v554_v25 = vpop.permute.xlu1 %553 }
 0x550   :  { %v556_v27 = vmul.f32 %v554_v25, %v2679_v42 }
 0x552   :  { %v557_v28 = vadd.f32 %v556_v27, %v548_v19 }
 0x554   :  { %562 = vrot.lane.b32.xlu0 %v557_v28, %s2348_s8 }
 0x557   :  { %v595_v29 = vpop.permute.xlu1 %594 }
 0x558   :  { %1942 = vmatpush.msk.msra.mxu0 %vm261_vm4, %v595_v29 }
 0x559   :  { %1943 = vmatmul.msk.f32.vlgmr.msra.gmra.mxu0 %vm258_vm5, %v2679_v42  ;;  %v622_v42 = vpop.permute.xlu2 %621 }
 0x55c   :  { %625 = vrot.lane.b32.xlu0 %v2612_v6, %s2346_s20 }
 0x55f   :  { %v2050_v46 = vpop.permute.xlu1 %2049 }
 0x560   :  { %v2052_v47 = vunpack.i.h.bf16 %v2050_v46  ;;  %v2051_v48 = vunpack.i.l.bf16 %v2050_v46  ;;  %v2769_v46 = vld [vmem:[%s3172_s10 + $0x2] ss:$0 sm:$0xff] }
 0x561   :  { %v2055_v45 = vpop.permute.xlu2 %2054  ;;  %836 = vrot.lane.b32.xlu2 %v2769_v46, %s2346_s20 }
 0x562   :  { %v2056_v49 = vunpack.i.l.bf16 %v2055_v45  ;;  %673 = vmatpush.msra.mxu1 %v2051_v48  ;;  %v2057_v52 = vunpack.i.h.bf16 %v2055_v45  ;;  %v2792_v48 = vld [vmem:[%s3174_s7 + $0x10] sm:$0xff] }
 0x564   :  { %674 = vmatpush.msra.mxu1 %v2052_v47 }
 0x566   :  { %675 = vmatpush.msra.mxu1 %v2056_v49  ;;  %v2797_v49 = vld [vmem:[%s3174_s7 + $0x60] sm:$0xff] }
 0x567   :  { %v2060_v53 = vpop.permute.xlu1 %2059 }
 0x568   :  { %v2062_v55 = vunpack.i.h.bf16 %v2060_v53  ;;  %v2061_v56 = vunpack.i.l.bf16 %v2060_v53  ;;  %676 = vmatpush.msra.mxu1 %v2057_v52  ;;  %v2083_v52 = vpack.i.bf16 %v2797_v49, %v2640_v31 }
 0x569   :  { %v2065_v34 = vpop.permute.xlu2 %2064 }
 0x56a   :  { %v2067_v54 = vunpack.i.h.bf16 %v2065_v34  ;;  %v2066_v40 = vunpack.i.l.bf16 %v2065_v34  ;;  %709 = vmatpush.msrb.mxu2 %v2061_v56  ;;  %v2093_v34 = vpack.i.bf16 %v2792_v48, %v2650_v33  ;;  %2084 = vrot.lane.b32.xlu2 %v2083_v52, %s2341_s21 }
 0x56c   :  { %741 = vmatpush.msra.mxu3 %v2066_v40  ;;  %710 = vmatpush.msrb.mxu2 %v2062_v55 }
 0x56e   :  { %742 = vmatpush.msra.mxu3 %v2067_v54 }
 0x56f   :  { %v2070_v58 = vpop.permute.xlu1 %2069 }
 0x570   :  { %v2072_v61 = vunpack.i.h.bf16 %v2070_v58  ;;  %v2071_v62 = vunpack.i.l.bf16 %v2070_v58 }
 0x571   :  { %v2075_v57 = vpop.permute.xlu2 %2074 }
 0x572   :  { %v2077_v59 = vunpack.i.h.bf16 %v2075_v57  ;;  %v2076_v60 = vunpack.i.l.bf16 %v2075_v57  ;;  %711 = vmatpush.msrb.mxu2 %v2071_v62 }
 0x574   :  { %743 = vmatpush.msra.mxu3 %v2076_v60  ;;  %712 = vmatpush.msrb.mxu2 %v2072_v61 }
 0x576   :  { %744 = vmatpush.msra.mxu3 %v2077_v59 }
 0x577   :  { %v803_v8 = vpop.permute.xlu1 %802 }
 0x579   :  { %v805_v7 = vpop.permute.xlu2 %804 }
 0x57a   :  { %v807_v9 = vsel %vm806_vm6, %v803_v8, %v805_v7 }
 0x57b   :  { %1949 = vmatpush.msk.msrb.mxu1 %vm261_vm4, %v807_v9 }
 0x5bb   :  { %v837_v56 = vpop.permute.xlu2 %836 }
 0x5c6   :  { %v563_v41 = vpop.permute.xlu0 %562 }
 0x5c7   :  { %1941 = vmatmul.msk.f32.vlgmr.msrb.gmra.mxu3 %vm258_vm5, %v563_v41 }
 0x5ce   :  { %v626_v3 = vpop.permute.xlu0 %625 }
 0x5d6   :  { %v615_v63 = vpop.f32.mrf.mxu0 }
 0x64a   :  { %v589_v0 = vpop.f32.mrf.mxu3 }
 0x64b   :  { %v616_v1 = vadd.f32 %v615_v63, %v589_v0  ;;  %v2085_v63 = vpop.permute.xlu2 %2084 }
 0x64c   :  { %v2087_v0 = vunpack.i.h.bf16 %v2085_v63 }
 0x64d   :  { %v624_v2 = vadd.f32 %v622_v42, %v616_v1  ;;  %v2760_v42 = vadd.f32 %v2624_v16, %v2622_v15  ;;  %v2774_v15 = vld [vmem:[%s3174_s7 + $0x88] sm:$0xff]  ;;  %v2779_v16 = vld [vmem:[%s3174_s7 + $0x38] sm:$0xff]  ;;  %v2086_v1 = vunpack.i.l.bf16 %v2085_v63 }
 0x64e   :  { %v2088_v47 = vpack.i.bf16 %v2779_v16, %v2659_v39  ;;  %v2805_v53 = vpack.i.bf16 %v2797_v49, %v2774_v15  ;;  %v2817_v54 = vpack.i.bf16 %v2792_v48, %v2779_v16 }
 0x64f   :  { %v628_v4 = vadd.f32 %v626_v3, %v624_v2  ;;  %v883_v3 = vsel %vm157_vm3, %v2086_v1, %v2087_v0 }
 0x651   :  { %v629_v5 = vmax.f32 %v628_v4, 0.0 }
 0x653   :  { %638 = vrot.lane.b32.xlu0 %v629_v5, %s2339_s4 }
 0x65b   :  { %656 = vrot.lane.b32.xlu0 %v2303_v10, %s2352_s18 }
 0x6c5   :  { %v639_v14 = vpop.permute.xlu0 %638 }
 0x6c6   :  { %1944 = vmatmul.msk.f32.vlgmr.msra.gmra.mxu1 %vm125_vm1, %v639_v14  ;;  %1946 = vmatmul.msk.f32.vlgmr.msra.gmra.mxu3 %vm125_vm1, %v639_v14 }
 0x6c7   :  { %1958 = vmatpush.msk.msra.mxu1 %vm261_vm4, %v1015_v13 }
 0x6cd   :  { %v657_v17 = vpop.permute.xlu0 %656 }
 0x6ce   :  { %1950 = vmatmul.msk.f32.vlgmr.msrb.gmra.mxu1 %vm258_vm5, %v624_v2 }
 0x743   :  { %v678_v18 = vpop.f32.mrf.mxu1 }
 0x744   :  { %v679_v19 = vadd.f32 %v678_v18, %v657_v17 }
 0x746   :  { %v681_v21 = vmax.f32 %v679_v19, 0.0 }
 0x748   :  { %1945 = vmatmul.msk.f32.vlgmr.msrb.gmra.mxu2 %vm125_vm1, %v681_v21 }
 0x749   :  { %v746_v23 = vpop.f32.mrf.mxu3 }
 0x7cb   :  { %v714_v24 = vpop.f32.mrf.mxu2 }
 0x7cc   :  { %v747_v25 = vadd.f32 %v746_v23, %v714_v24  ;;  %v830_v23 = vpop.f32.mrf.mxu1 }
 0x7ce   :  { %v750_v27 = vadd.f32 %v2721_v30, %v747_v25 }
 0x7d0   :  { %2315 = vtanh.f32 %v750_v27 }
 0x7d6   :  { %v2752_v28 = vpop.eup %2315 }
 0x7d7   :  { %v752_v29 = vmul.f32 1.442695, %v2752_v28 }
 0x7d9   :  { %2317 = vpow2.f32 %v752_v29 }
 0x7df   :  { %v2318_v41 = vpop.eup %2317 }
 0x7e0   :  { %755 = vrot.lane.b32.xlu0 %v2318_v41, %s2347_s27 }
 0x7e8   :  { %772 = vrot.lane.b32.xlu0 %v2697_v12, %s2344_s16  ;;  %v2078_v12 = vpack.i.bf16 %v2774_v15, %v2645_v32 }
 0x7f0   :  { %841 = vrot.lane.b32.xlu0 %v2760_v42, %s2341_s21 }
 0x7f8   :  { %2089 = vrot.lane.b32.xlu0 %v2088_v47, %s2341_s21 }
 0x800   :  { %2099 = vrot.lane.b32.xlu0 %v2805_v53, %s2338_s30 }
 0x808   :  { %2109 = vrot.lane.b32.xlu0 %v2805_v53, %s2344_s16 }
 0x852   :  { %v756_v30 = vpop.permute.xlu0 %755 }
 0x853   :  { %v758_v43 = vmul.f32 %v756_v30, %v624_v2 }
 0x855   :  { %v759_v44 = vadd.f32 %v758_v43, %v750_v27 }
 0x857   :  { %767 = vrot.lane.b32.xlu1 %v759_v44, %s2348_s8 }
 0x85a   :  { %v773_v45 = vpop.permute.xlu0 %772 }
 0x85b   :  { %1947 = vmatpush.msk.msrb.mxu0 %vm261_vm4, %v773_v45 }
 0x85f   :  { %2079 = vrot.lane.b32.xlu1 %v2078_v12, %s2341_s21 }
 0x862   :  { %v842_v55 = vpop.permute.xlu0 %841 }
 0x867   :  { %2094 = vrot.lane.b32.xlu1 %v2093_v34, %s2341_s21 }
 0x86a   :  { %v2090_v58 = vpop.permute.xlu0 %2089 }
 0x86b   :  { %v2092_v61 = vunpack.i.h.bf16 %v2090_v58  ;;  %v2091_v62 = vunpack.i.l.bf16 %v2090_v58 }
 0x86d   :  { %v882_v4 = vsel %vm157_vm3, %v2091_v62, %v2092_v61 }
 0x86f   :  { %889 = vrot.lane.b32.xlu1 %v2769_v46, %s2339_s4 }
 0x872   :  { %v2100_v7 = vpop.permute.xlu0 %2099 }
 0x873   :  { %v2102_v10 = vunpack.i.h.bf16 %v2100_v7  ;;  %v2101_v13 = vunpack.i.l.bf16 %v2100_v7 }
 0x875   :  { %942 = vmatpush.msrb.mxu3 %v2101_v13 }
 0x877   :  { %2114 = vrot.lane.b32.xlu1 %v2817_v54, %s2344_s16  ;;  %943 = vmatpush.msrb.mxu3 %v2102_v10  ;;  %v2855_v10 = vld [vmem:[%s3180_s3] sm:$0xff] }
 0x87a   :  { %v2110_v18 = vpop.permute.xlu0 %2109 }
 0x87b   :  { %v2112_v19 = vunpack.i.h.bf16 %v2110_v18  ;;  %v2111_v21 = vunpack.i.l.bf16 %v2110_v18 }
 0x87d   :  { %974 = vmatpush.msra.mxu0 %v2111_v21 }
 0x87f   :  { %975 = vmatpush.msra.mxu0 %v2112_v19 }
 0x8c9   :  { %v768_v40 = vpop.permute.xlu1 %767 }
 0x8ca   :  { %1948 = vmatmul.msk.f32.vlgmr.msrb.gmra.mxu0 %vm258_vm5, %v768_v40 }
 0x8d1   :  { %v2080_v57 = vpop.permute.xlu1 %2079 }
 0x8d2   :  { %v2082_v59 = vunpack.i.h.bf16 %v2080_v57  ;;  %v2081_v60 = vunpack.i.l.bf16 %v2080_v57 }
 0x8d4   :  { %v884_v2 = vsel %vm157_vm3, %v2081_v60, %v2082_v59 }
 0x8d5   :  { %906 = vmatpush.msra.mxu2 %v884_v2 }
 0x8d7   :  { %907 = vmatpush.msra.mxu2 %v883_v3 }
 0x8d9   :  { %v2095_v5 = vpop.permute.xlu1 %2094  ;;  %908 = vmatpush.msra.mxu2 %v882_v4 }
 0x8da   :  { %v2097_v8 = vunpack.i.h.bf16 %v2095_v5  ;;  %v2096_v9 = vunpack.i.l.bf16 %v2095_v5 }
 0x8dc   :  { %v881_v14 = vsel %vm157_vm3, %v2096_v9, %v2097_v8  ;;  %v2133_v9 = vpack.i.bf16 %v2640_v31, %v2531_v36 }
 0x8dd   :  { %909 = vmatpush.msra.mxu2 %v881_v14 }
 0x8df   :  { %1960 = vmatpush.msk.msrb.mxu2 %vm261_vm4, %v2743_v11  ;;  %v2353_v11 = vmov 0.0  }
 0x8e1   :  { %v890_v17 = vpop.permute.xlu1 %889 }
 0x8e9   :  { %v2115_v27 = vpop.permute.xlu1 %2114 }
 0x8ea   :  { %v2117_v29 = vunpack.i.h.bf16 %v2115_v27  ;;  %v2116_v41 = vunpack.i.l.bf16 %v2115_v27  ;;  %v2305_v27 = vld [vmem:[%s3172_s10] ss:$0 sm:$0xff] }
 0x8ec   :  { %976 = vmatpush.msra.mxu0 %v2116_v41 }
 0x8ee   :  { %977 = vmatpush.msra.mxu0 %v2117_v29  ;;  %v2138_v29 = vpack.i.bf16 %v2659_v39, %v2537_v37 }
 0x947   :  { %v795_v24 = vpop.f32.mrf.mxu0 }
 0x948   :  { %v831_v25 = vadd.f32 %v830_v23, %v795_v24 }
 0x94a   :  { %v839_v30 = vadd.f32 %v837_v56, %v831_v25 }
 0x94c   :  { %v844_v43 = vadd.f32 %v842_v55, %v839_v30  ;;  %vm1000_vm7 = vcmp.gt.f32.partialorder %v839_v30, 0.0 }
 0x94d   :  { %v1954_v45 = vsel %vm1000_vm7, 1.0, %v2353_v11 }
 0x94e   :  { %v845_v44 = vmax.f32 %v844_v43, 0.0  ;;  %v1003_v47 = vmul.f32 2.0, %v1954_v45 }
 0x950   :  { %855 = vrot.lane.b32.xlu2 %v845_v44, %s2339_s4  ;;  %v1955_v52 = vadd.f32 -1.0, %v1003_v47 }
 0x958   :  { %2104 = vrot.lane.b32.xlu2 %v2817_v54, %s2338_s30 }
 0x960   :  { %982 = vrot.lane.b32.xlu2 %v2769_v46, %s2340_s0 }
 0x9aa   :  { %v856_v12 = vpop.permute.xlu2 %855 }
 0x9ab   :  { %1951 = vmatmul.msk.f32.vlgmr.msra.gmra.mxu2 %vm125_vm1, %v856_v12  ;;  %1953 = vmatmul.msk.f32.vlgmr.msra.gmra.mxu0 %vm125_vm1, %v856_v12 }
 0x9b2   :  { %v2105_v34 = vpop.permute.xlu2 %2104 }
 0x9b3   :  { %1961 = vmatmul.msk.f32.vlgmr.msrb.gmra.mxu2 %vm258_vm5, %v1955_v52  ;;  %v2107_v40 = vunpack.i.h.bf16 %v2105_v34  ;;  %v2106_v55 = vunpack.i.l.bf16 %v2105_v34 }
 0x9b5   :  { %944 = vmatpush.msrb.mxu3 %v2106_v55 }
 0x9b7   :  { %945 = vmatpush.msrb.mxu3 %v2107_v40 }
 0x9ba   :  { %v983_v60 = vpop.permute.xlu2 %982 }
 0xa28   :  { %v979_v58 = vpop.f32.mrf.mxu0 }
 0xa2e   :  { %v911_v56 = vpop.f32.mrf.mxu2 }
 0xa2f   :  { %v912_v57 = vadd.f32 %v911_v56, %v890_v17  ;;  %v1131_v56 = vld [vmem:[%s3172_s10] sm:$0x3] }
 0xa31   :  { %v914_v46 = vmax.f32 %v912_v57, 0.0  ;;  %v1134_v57 = vperm.slane %v1131_v56, 1 }
 0xa33   :  { %1952 = vmatmul.msk.f32.vlgmr.msrb.gmra.mxu3 %vm125_vm1, %v914_v46  ;;  %v1133_v46 = vperm.slane %v1131_v56, 0  ;;  %v2966_v56 = vld [vmem:[%s3172_s10 + $0x3] ss:$0 sm:$0xff] }
 0xab6   :  { %v947_v59 = vpop.f32.mrf.mxu3 }
 0xab7   :  { %v980_v61 = vadd.f32 %v979_v58, %v947_v59 }
 0xab9   :  { %v985_v62 = vadd.f32 %v983_v60, %v980_v61 }
 0xabb   :  { %2319 = vtanh.f32 %v985_v62 }
 0xac1   :  { %v2837_v63 = vpop.eup %2319 }
 0xac2   :  { %v987_v0 = vmul.f32 1.442695, %v2837_v63 }
 0xac4   :  { %2321 = vpow2.f32 %v987_v0  ;;  %v2899_v0 = vld [vmem:[%s3181_s9] sm:$0xff] }
 0xaca   :  { %v2322_v1 = vpop.eup %2321 }
 0xacb   :  { %990 = vrot.lane.b32.xlu0 %v2322_v1, %s2347_s27 }
 0xad3   :  { %2119 = vrot.lane.b32.xlu0 %v2572_v50, %s2345_s17  ;;  %v2143_v50 = vpack.i.bf16 %v2650_v33, %v2543_v38 }
 0xb3d   :  { %v991_v2 = vpop.permute.xlu0 %990 }
 0xb3e   :  { %v993_v3 = vmul.f32 %v991_v2, %v839_v30 }
 0xb40   :  { %v994_v4 = vadd.f32 %v993_v3, %v985_v62  ;;  %v2894_v62 = vld [vmem:[%s3181_s9 + $0x18] sm:$0xff] }
 0xb41   :  { %1245 = vmatpush.msrb.mxu1 %v2894_v62 }
 0xb42   :  { %vm1005_vm8 = vcmp.gt.f32.partialorder %v994_v4, 0.0 }
 0xb43   :  { %v1956_v5 = vsel %vm1005_vm8, 1.0, %v2353_v11  ;;  %1246 = vmatpush.msrb.mxu1 %v2899_v0 }
 0xb44   :  { %v1008_v7 = vmul.f32 2.0, %v1956_v5 }
 0xb45   :  { %v2120_v38 = vpop.permute.xlu0 %2119 }
 0xb46   :  { %v1957_v8 = vadd.f32 -1.0, %v1008_v7  ;;  %v2122_v33 = vunpack.i.h.bf16 %v2120_v38  ;;  %v2121_v17 = vunpack.i.l.bf16 %v2120_v38 }
 0xb48   :  { %1012 = vrot.lane.b32.xlu1 %v1957_v8, %s2348_s8  ;;  %1114 = vmatpush.msra.mxu3 %v2121_v17 }
 0xb4a   :  { %1115 = vmatpush.msra.mxu3 %v2122_v33 }
 0xb50   :  { %2124 = vrot.lane.b32.xlu1 %v2576_v51, %s2345_s17  ;;  %v1062_v51 = vpop.f32.mrf.mxu2 }
 0xb58   :  { %2134 = vrot.lane.b32.xlu1 %v2133_v9, %s2346_s20 }
 0xb60   :  { %2144 = vrot.lane.b32.xlu1 %v2143_v50, %s2346_s20 }
 0xb68   :  { %1212 = vrot.lane.b32.xlu1 %v2855_v10, %s2352_s18 }
 0xbba   :  { %v1013_v13 = vpop.permute.xlu1 %1012 }
 0xbbb   :  { %1959 = vmatmul.msk.f32.vlgmr.msra.gmra.mxu1 %vm258_vm5, %v1013_v13  ;;  %v2913_v13 = vld [vmem:[%s3174_s7 + $0x68] sm:$0xff] }
 0xbc2   :  { %v2125_v18 = vpop.permute.xlu1 %2124 }
 0xbc3   :  { %v2126_v19 = vunpack.i.l.bf16 %v2125_v18  ;;  %v2127_v21 = vunpack.i.h.bf16 %v2125_v18 }
 0xbc5   :  { %1116 = vmatpush.msra.mxu3 %v2126_v19 }
 0xbc7   :  { %1117 = vmatpush.msra.mxu3 %v2127_v21 }
 0xbca   :  { %v2135_v41 = vpop.permute.xlu1 %2134 }
 0xbcb   :  { %v2137_v30 = vunpack.i.h.bf16 %v2135_v41  ;;  %v2136_v43 = vunpack.i.l.bf16 %v2135_v41 }
 0xbcd   :  { %v1162_v45 = vsel %vm1159_vm9, %v2136_v43, %v2137_v30  ;;  %v2943_v43 = vld [vmem:[%s3174_s7 + $0x90] sm:$0xff] }
 0xbd2   :  { %v2145_v47 = vpop.permute.xlu1 %2144 }
 0xbd3   :  { %v2147_v52 = vunpack.i.h.bf16 %v2145_v47  ;;  %v2146_v34 = vunpack.i.l.bf16 %v2145_v47 }
 0xbd5   :  { %v1160_v55 = vsel %vm1159_vm9, %v2146_v34, %v2147_v52 }
 0xbda   :  { %v1213_v9 = vpop.permute.xlu1 %1212 }
 0xc38   :  { %v1037_v36 = vpop.f32.mrf.mxu1 }
 0xc39   :  { %v1063_v31 = vadd.f32 %v1062_v51, %v1037_v36  ;;  %v2163_v51 = vpack.i.bf16 %v2913_v13, %v2797_v49  ;;  %v2921_v36 = vld [vmem:[%s3174_s7 + $0x40] sm:$0xff]  ;;  %v2188_v49 = vpack.i.bf16 %v2899_v0, %v2894_v62 }
 0xc3b   :  { %v2861_v14 = vadd.f32 %v1063_v31, %v2760_v42  ;;  %1066 = vrot.lane.b32.xlu2 %v1063_v31, %s2352_s18  ;;  %v2128_v42 = vpack.i.bf16 %v2645_v32, %v2525_v35  ;;  %v2168_v31 = vpack.i.bf16 %v2921_v36, %v2779_v16 }
 0xc3d   :  { %1225 = vrot.lane.b32.xlu1 %v2861_v14, %s2338_s30  ;;  %2129 = vrot.lane.b32.xlu0 %v2128_v42, %s2346_s20 }
 0xc45   :  { %2139 = vrot.lane.b32.xlu0 %v2138_v29, %s2346_s20  ;;  %2164 = vrot.lane.b32.xlu1 %v2163_v51, %s2351_s1 }
 0xc4d   :  { %1170 = vrot.lane.b32.xlu0 %v1134_v57, %s2341_s21  ;;  %2179 = vrot.lane.b32.xlu1 %v2805_v53, %s2343_s24 }
 0xc55   :  { %2149 = vrot.lane.b32.xlu0 %v2805_v53, %s2340_s0 }
 0xc95   :  { %v1067_v23 = vpop.permute.xlu2 %1066 }
 0xc96   :  { %v1069_v24 = vadd.f32 %v1067_v23, %v2612_v6 }
 0xc98   :  { %v1070_v25 = vmax.f32 %v1069_v24, 0.0 }
 0xc9a   :  { %1079 = vrot.lane.b32.xlu2 %v1070_v25, %s2338_s30 }
 0xca2   :  { %1097 = vrot.lane.b32.xlu2 %v2305_v27, %s2346_s20 }
 0xcaa   :  { %1168 = vrot.lane.b32.xlu2 %v1133_v46, %s2341_s21 }
 0xcaf   :  { %v2130_v35 = vpop.permute.xlu0 %2129 }
 0xcb0   :  { %v2132_v32 = vunpack.i.h.bf16 %v2130_v35  ;;  %v2131_v44 = vunpack.i.l.bf16 %v2130_v35 }
 0xcb2   :  { %v1163_v11 = vsel %vm1159_vm9, %v2131_v44, %v2132_v32  ;;  %v2158_v44 = vpack.i.bf16 %v2943_v43, %v2774_v15 }
 0xcb3   :  { %1189 = vmatpush.msrb.mxu0 %v1163_v11  ;;  %v2951_v11 = vld [vmem:[%s3174_s7 + $0x18] sm:$0xff] }
 0xcb4   :  { %2159 = vrot.lane.b32.xlu0 %v2158_v44, %s2351_s1 }
 0xcb5   :  { %1190 = vmatpush.msrb.mxu0 %v1162_v45  ;;  %v2173_v45 = vpack.i.bf16 %v2951_v11, %v2792_v48 }
 0xcb7   :  { %v2140_v12 = vpop.permute.xlu0 %2139 }
 0xcb8   :  { %v2142_v37 = vunpack.i.h.bf16 %v2140_v12  ;;  %v2141_v39 = vunpack.i.l.bf16 %v2140_v12 }
 0xcba   :  { %v1161_v40 = vsel %vm1159_vm9, %v2141_v39, %v2142_v37 }
 0xcbb   :  { %1191 = vmatpush.msrb.mxu0 %v1161_v40 }
 0xcbc   :  { %2174 = vrot.lane.b32.xlu0 %v2173_v45, %s2351_s1 }
 0xcbd   :  { %1192 = vmatpush.msrb.mxu0 %v1160_v55 }
 0xcbf   :  { %v1171_v2 = vpop.permute.xlu0 %1170 }
 0xcc4   :  { %1388 = vrot.lane.b32.xlu0 %v2966_v56, %s2338_s30 }
 0xcc7   :  { %v2150_v16 = vpop.permute.xlu0 %2149 }
 0xcc8   :  { %v2152_v17 = vunpack.i.h.bf16 %v2150_v16  ;;  %v2151_v18 = vunpack.i.l.bf16 %v2150_v16 }
 0xcca   :  { %1283 = vmatpush.msra.mxu2 %v2151_v18 }
 0xccc   :  { %1284 = vmatpush.msra.mxu2 %v2152_v17 }
 0xcf4   :  { %v1080_v6 = vpop.permute.xlu2 %1079 }
 0xcf5   :  { %1962 = vmatmul.msk.f32.vlgmr.msra.gmra.mxu3 %vm125_vm1, %v1080_v6 }
 0xcfc   :  { %v1098_v58 = vpop.permute.xlu2 %1097 }
 0xd04   :  { %v1169_v1 = vpop.permute.xlu2 %1168 }
 0xd05   :  { %v1172_v3 = vsel %vm157_vm3, %v1169_v1, %v1171_v2 }
 0xd26   :  { %v2160_v15 = vpop.permute.xlu0 %2159 }
 0xd27   :  { %v2162_v47 = vunpack.i.h.bf16 %v2160_v15  ;;  %v2161_v52 = vunpack.i.l.bf16 %v2160_v15 }
 0xd29   :  { %v1328_v34 = vsel %vm1324_vm10, %v2161_v52, %v2162_v47 }
 0xd2a   :  { %1348 = vmatpush.msrb.mxu3 %v1328_v34 }
 0xd78   :  { %v1119_v59 = vpop.f32.mrf.mxu3 }
 0xd79   :  { %v1120_v60 = vadd.f32 %v1119_v59, %v1098_v58  ;;  %v2175_v58 = vpop.permute.xlu0 %2174 }
 0xd7a   :  { %v2177_v59 = vunpack.i.h.bf16 %v2175_v58 }
 0xd7b   :  { %v1122_v61 = vmax.f32 %v1120_v60, 0.0  ;;  %v2176_v60 = vunpack.i.l.bf16 %v2175_v58  ;;  %v1614_v58 = vld [vmem:[%s3181_s9 + $0x28] sm:$0xff] }
 0xd7d   :  { %1963 = vmatmul.msk.f32.vlgmr.msrb.gmra.mxu0 %vm125_vm1, %v1122_v61  ;;  %v1325_v1 = vsel %vm1324_vm10, %v2176_v60, %v2177_v59 }
 0xd81   :  { %v1389_v51 = vpop.permute.xlu0 %1388 }
 0xdfa   :  { %v1194_v4 = vpop.f32.mrf.mxu0 }
 0xdfb   :  { %v2904_v5 = vadd.f32 %v1194_v4, %v1172_v3 }
 0xdfd   :  { %v1209_v7 = vmul.f32 1.442695, %v2904_v5 }
 0xdff   :  { %2323 = vpow2.f32 %v1209_v7  ;;  %v2977_v7 = vld [vmem:[%s3181_s9 + $0x20] sm:$0xff] }
 0xe05   :  { %v2324_v8 = vpop.eup %2323 }
 0xe06   :  { %v1215_v50 = vmul.f32 %v2324_v8, %v1213_v9  ;;  %v2193_v8 = vpack.i.bf16 %v2977_v7, %v2894_v62  ;;  %v2989_v62 = vld [vmem:[%s3181_s9 + $0x8] sm:$0xff] }
 0xe07   :  { %v2198_v18 = vpack.i.bf16 %v2989_v62, %v2899_v0  ;;  %v2238_v47 = vpack.i.bf16 %v2989_v62, %v2977_v7 }
 0xe08   :  { %1217 = vrot.lane.b32.xlu2 %v1215_v50, %s2338_s30  ;;  %2194 = vrot.lane.b32.xlu0 %v2193_v8, %s2352_s18 }
 0xe10   :  { %2154 = vrot.lane.b32.xlu2 %v2817_v54, %s2340_s0 }
 0xe18   :  { %2169 = vrot.lane.b32.xlu2 %v2168_v31, %s2351_s1 }
 0xe20   :  { %2184 = vrot.lane.b32.xlu2 %v2817_v54, %s2343_s24  ;;  %v2938_v54 = vpop.permute.xlu1 %1225 }
 0xe28   :  { %2189 = vrot.lane.b32.xlu2 %v2188_v49, %s2338_s30  ;;  %v2165_v24 = vpop.permute.xlu1 %2164 }
 0xe29   :  { %v2167_v48 = vunpack.i.h.bf16 %v2165_v24  ;;  %v2166_v40 = vunpack.i.l.bf16 %v2165_v24 }
 0xe2b   :  { %v1327_v55 = vsel %vm1324_vm10, %v2166_v40, %v2167_v48  ;;  %v3038_v48 = vld [vmem:[%s3174_s7 + $0x70] sm:$0xff]  ;;  %v3043_v40 = vld [vmem:[%s3174_s7 + $0x98] sm:$0xff] }
 0xe2c   :  { %1349 = vmatpush.msrb.mxu3 %v1327_v55 }
 0xe30   :  { %v2180_v25 = vpop.permute.xlu1 %2179 }
 0xe31   :  { %v2182_v27 = vunpack.i.h.bf16 %v2180_v25  ;;  %v2181_v29 = vunpack.i.l.bf16 %v2180_v25 }
 0xe33   :  { %1380 = vmatpush.msra.mxu0 %v2181_v29 }
 0xe35   :  { %1381 = vmatpush.msra.mxu0 %v2182_v27 }
 0xe62   :  { %v1218_v38 = vpop.permute.xlu2 %1217 }
 0xe63   :  { %v2934_v33 = vadd.f32 %v1218_v38, %v2904_v5 }
 0xe65   :  { %1964 = vmatmul.msk.f32.vlgmr.msrb.gmra.mxu1 %vm806_vm6, %v2934_v33 }
 0xe6a   :  { %v2155_v19 = vpop.permute.xlu2 %2154 }
 0xe6b   :  { %v2156_v53 = vunpack.i.l.bf16 %v2155_v19  ;;  %v2157_v21 = vunpack.i.h.bf16 %v2155_v19 }
 0xe6d   :  { %1285 = vmatpush.msra.mxu2 %v2156_v53 }
 0xe6f   :  { %1286 = vmatpush.msra.mxu2 %v2157_v21 }
 0xe72   :  { %v2170_v23 = vpop.permute.xlu2 %2169 }
 0xe73   :  { %v2172_v57 = vunpack.i.h.bf16 %v2170_v23  ;;  %v2171_v46 = vunpack.i.l.bf16 %v2170_v23 }
 0xe75   :  { %v1326_v61 = vsel %vm1324_vm10, %v2171_v46, %v2172_v57  ;;  %v3064_v46 = vld [vmem:[%s3181_s9 + $0x10] sm:$0xff] }
 0xe76   :  { %1350 = vmatpush.msrb.mxu3 %v1326_v61  ;;  %v3070_v59 = vpack.i.bf16 %v3064_v46, %v1614_v58 }
 0xe78   :  { %1351 = vmatpush.msrb.mxu3 %v1325_v1 }
 0xe7a   :  { %v2185_v42 = vpop.permute.xlu2 %2184  ;;  %v2195_v19 = vpop.permute.xlu0 %2194 }
 0xe7b   :  { %v2186_v6 = vunpack.i.l.bf16 %v2185_v42  ;;  %v2187_v41 = vunpack.i.h.bf16 %v2185_v42  ;;  %v2197_v53 = vunpack.i.h.bf16 %v2195_v19  ;;  %v2196_v21 = vunpack.i.l.bf16 %v2195_v19 }
 0xe7d   :  { %1382 = vmatpush.msra.mxu0 %v2186_v6  ;;  %v1424_v23 = vsel %vm125_vm1, %v2196_v21, %v2197_v53 }
 0xe7e   :  { %1443 = vmatpush.msra.mxu1 %v1424_v23 }
 0xe7f   :  { %1383 = vmatpush.msra.mxu0 %v2187_v41  ;;  %v3001_v41 = vld [vmem:[%s3172_s10 + $0x4] ss:$0 sm:$0xff] }
 0xe80   :  { %1480 = vrot.lane.b32.xlu0 %v3001_v41, %s2342_s23 }
 0xe82   :  { %v2190_v30 = vpop.permute.xlu2 %2189 }
 0xe83   :  { %v2192_v35 = vunpack.i.h.bf16 %v2190_v30  ;;  %v2191_v32 = vunpack.i.l.bf16 %v2190_v30  ;;  %v2203_v30 = vpack.i.bf16 %v2913_v13, %v2943_v43 }
 0xe85   :  { %1471 = vmatpush.msrb.mxu2 %v2191_v32 }
 0xe87   :  { %1472 = vmatpush.msrb.mxu2 %v2192_v35  ;;  %v2208_v35 = vpack.i.bf16 %v2951_v11, %v2921_v36 }
 0xee2   :  { %v1248_v12 = vpop.f32.mrf.mxu1 }
 0xee3   :  { %v1249_v37 = vadd.f32 %v1248_v12, %v2938_v54 }
 0xee5   :  { %v1251_v39 = vmax.f32 %v1249_v37, 0.0 }
 0xee7   :  { %1965 = vmatmul.msk.f32.vlgmr.msra.gmra.mxu2 %vm125_vm1, %v1251_v39  ;;  %1967 = vmatmul.msk.f32.vlgmr.msra.gmra.mxu0 %vm125_vm1, %v1251_v39 }
 0xeef   :  { %1969 = vmatmul.msk.f32.vlgmr.msrb.gmra.mxu2 %vm806_vm6, %v2934_v33 }
 0xef2   :  { %v1481_v45 = vpop.permute.xlu0 %1480 }
 0xf64   :  { %v1385_v9 = vpop.f32.mrf.mxu0 }
 0xf6a   :  { %v1288_v2 = vpop.f32.mrf.mxu2 }
 0xf6b   :  { %v1289_v3 = vadd.f32 %v2966_v56, %v1288_v2 }
 0xf6d   :  { %v1291_v4 = vmax.f32 %v1289_v3, 0.0 }
 0xf6f   :  { %1966 = vmatmul.msk.f32.vlgmr.msrb.gmra.mxu3 %vm125_vm1, %v1291_v4 }
 0xf72   :  { %v1474_v32 = vpop.f32.mrf.mxu2 }
 0xff2   :  { %v1353_v50 = vpop.f32.mrf.mxu3 }
 0xff3   :  { %v1386_v31 = vadd.f32 %v1385_v9, %v1353_v50 }
 0xff5   :  { %v1391_v49 = vadd.f32 %v1389_v51, %v1386_v31  ;;  %v760_v51 = vsel %vm258_vm5, %v2752_v28, 0.0 }
 0xff7   :  { %2325 = vtanh.f32 %v1391_v49 }
 0xffd   :  { %v2982_v38 = vpop.eup %2325 }
 0xffe   :  { %v1393_v16 = vmul.f32 1.442695, %v2982_v38 }
0x1000   :  { %2327 = vpow2.f32 %v1393_v16 }
0x1006   :  { %v2328_v17 = vpop.eup %2327 }
0x1007   :  { %1396 = vrot.lane.b32.xlu1 %v2328_v17, %s2349_s28 }
0x100f   :  { %2199 = vrot.lane.b32.xlu1 %v2198_v18, %s2352_s18 }
0x1017   :  { %2204 = vrot.lane.b32.xlu1 %v2203_v30, %s2339_s4 }
0x101f   :  { %2214 = vrot.lane.b32.xlu1 %v2203_v30, %s2343_s24 }
0x1027   :  { %2224 = vrot.lane.b32.xlu1 %v2208_v35, %s2343_s24 }
0x1079   :  { %v1397_v24 = vpop.permute.xlu1 %1396 }
0x107a   :  { %v1399_v25 = vmul.f32 %v1397_v24, %v2934_v33 }
0x107c   :  { %v1400_v42 = vadd.f32 %v1399_v25, %v1391_v49  ;;  %v1401_v49 = vsel %vm806_vm6, %v2982_v38, 0.0 }
0x107e   :  { %1409 = vrot.lane.b32.xlu2 %v1400_v42, %s2354_s5 }
0x1081   :  { %v2200_v27 = vpop.permute.xlu1 %2199 }
0x1082   :  { %v2202_v29 = vunpack.i.h.bf16 %v2200_v27  ;;  %v2201_v6 = vunpack.i.l.bf16 %v2200_v27 }
0x1084   :  { %v1423_v0 = vsel %vm125_vm1, %v2201_v6, %v2202_v29 }
0x1085   :  { %1444 = vmatpush.msra.mxu1 %v1423_v0 }
0x1086   :  { %2209 = vrot.lane.b32.xlu2 %v2208_v35, %s2339_s4 }
0x1089   :  { %v2205_v34 = vpop.permute.xlu1 %2204 }
0x108a   :  { %v2206_v55 = vunpack.i.l.bf16 %v2205_v34 }
0x108c   :  { %1518 = vmatpush.msra.mxu3 %v2206_v55 }
0x108e   :  { %2219 = vrot.lane.b32.xlu2 %v2203_v30, %s2340_s0 }
0x1091   :  { %v2215_v42 = vpop.permute.xlu1 %2214 }
0x1092   :  { %v2217_v27 = vunpack.i.h.bf16 %v2215_v42  ;;  %v2216_v29 = vunpack.i.l.bf16 %v2215_v42 }
0x1094   :  { %1554 = vmatpush.msrb.mxu0 %v2216_v29 }
0x1096   :  { %2229 = vrot.lane.b32.xlu2 %v2208_v35, %s2340_s0  ;;  %1555 = vmatpush.msrb.mxu0 %v2217_v27 }
0x1099   :  { %v2225_v6 = vpop.permute.xlu1 %2224 }
0x109a   :  { %v2227_v0 = vunpack.i.h.bf16 %v2225_v6  ;;  %v2226_v30 = vunpack.i.l.bf16 %v2225_v6 }
0x109c   :  { %1556 = vmatpush.msrb.mxu0 %v2226_v30 }
0x109e   :  { %1557 = vmatpush.msrb.mxu0 %v2227_v0 }
0x10d8   :  { %v1410_v33 = vpop.permute.xlu2 %1409 }
0x10d9   :  { %1968 = vmatmul.msk.f32.vlgmr.msra.gmra.mxu1 %vm806_vm6, %v1410_v33 }
0x10e0   :  { %v2210_v60 = vpop.permute.xlu2 %2209 }
0x10e1   :  { %v2212_v61 = vunpack.i.h.bf16 %v2210_v60  ;;  %v2211_v1 = vunpack.i.l.bf16 %v2210_v60 }
0x10e8   :  { %v2220_v2 = vpop.permute.xlu2 %2219 }
0x10e9   :  { %v2222_v3 = vunpack.i.h.bf16 %v2220_v2  ;;  %v2221_v4 = vunpack.i.l.bf16 %v2220_v2 }
0x10eb   :  { %1586 = vmatpush.msrb.mxu1 %v2221_v4 }
0x10ed   :  { %1587 = vmatpush.msrb.mxu1 %v2222_v3 }
0x10f0   :  { %v2230_v8 = vpop.permute.xlu2 %2229 }
0x10f1   :  { %v2232_v9 = vunpack.i.h.bf16 %v2230_v8  ;;  %v2231_v50 = vunpack.i.l.bf16 %v2230_v8 }
0x10f3   :  { %1588 = vmatpush.msrb.mxu1 %v2231_v50  ;;  %v2253_v50 = vpack.i.bf16 %v3038_v48, %v2913_v13 }
0x10f5   :  { %1589 = vmatpush.msrb.mxu1 %v2232_v9 }
0x1156   :  { %v1446_v44 = vpop.f32.mrf.mxu1 }
0x1157   :  { %v1475_v12 = vadd.f32 %v1474_v32, %v1446_v44  ;;  %v2233_v44 = vpack.i.bf16 %v1614_v58, %v2977_v7 }
0x1159   :  { %v3016_v37 = vadd.f32 %v1481_v45, %v1475_v12  ;;  %2234 = vrot.lane.b32.xlu2 %v2233_v44, %s2352_s18 }
0x115b   :  { %v1484_v39 = vadd.f32 %v3016_v37, %v2938_v54  ;;  %v1698_v54 = vld [vmem:[%s3174_s7 + $0x48] sm:$0xff] }
0x115c   :  { %v2258_v52 = vpack.i.bf16 %v1698_v54, %v2921_v36  ;;  %v3054_v36 = vld [vmem:[%s3174_s7 + $0x20] sm:$0xff] }
0x115d   :  { %v1485_v15 = vmax.f32 %v1484_v39, 0.0  ;;  %v3057_v57 = vpack.i.bf16 %v3054_v36, %v1698_v54 }
0x115f   :  { %1487 = vrot.lane.b32.xlu0 %v1485_v15, %s2338_s30 }
0x1167   :  { %1501 = vrot.lane.b32.xlu0 %v2966_v56, %s2342_s23 }
0x116f   :  { %1594 = vrot.lane.b32.xlu0 %v2966_v56, %s2352_s18  ;;  %v3047_v56 = vpack.i.bf16 %v3038_v48, %v3043_v40 }
0x1177   :  { %2239 = vrot.lane.b32.xlu0 %v2238_v47, %s2338_s30 }
0x117f   :  { %1690 = vrot.lane.b32.xlu0 %v2861_v14, %s2342_s23  ;;  %v2207_v14 = vunpack.i.h.bf16 %v2205_v34  ;;  %v2243_v34 = vpack.i.bf16 %v3064_v46, %v2989_v62  ;;  %v2248_v46 = vpack.i.bf16 %v3043_v40, %v2943_v43 }
0x1181   :  { %1519 = vmatpush.msra.mxu3 %v2207_v14 }
0x1183   :  { %1520 = vmatpush.msra.mxu3 %v2211_v1 }
0x1185   :  { %1521 = vmatpush.msra.mxu3 %v2212_v61 }
0x1187   :  { %2259 = vrot.lane.b32.xlu0 %v2258_v52, %s2351_s1 }
0x118f   :  { %2269 = vrot.lane.b32.xlu0 %v3047_v56, %s2339_s4 }
0x1197   :  { %2284 = vrot.lane.b32.xlu0 %v3057_v57, %s2340_s0 }
0x119f   :  { %2289 = vrot.lane.b32.xlu0 %v3070_v59, %s2342_s23 }
0x11a7   :  { %377 = vrot.lane.b32.xlu0 %v2633_v26, %s2339_s4 }
0x11b3   :  { %v2235_v7 = vpop.permute.xlu2 %2234 }
0x11b4   :  { %v2237_v14 = vunpack.i.h.bf16 %v2235_v7  ;;  %v2236_v55 = vunpack.i.l.bf16 %v2235_v7 }
0x11b6   :  { %v1631_v58 = vsel %vm125_vm1, %v2236_v55, %v2237_v14 }
0x11b7   :  { %1650 = vmatpush.msra.mxu2 %v1631_v58 }
0x11d1   :  { %761 = vadd.xlane.f32.xlu0 %v760_v51  ;;  %v1488_v31 = vpop.permute.xlu0 %1487 }
0x11d2   :  { %1970 = vmatmul.msk.f32.vlgmr.msra.gmra.mxu3 %vm125_vm1, %v1488_v31  ;;  %1972 = vmatmul.msk.f32.vlgmr.msrb.gmra.mxu1 %vm125_vm1, %v1488_v31 }
0x11d9   :  { %1402 = vadd.xlane.f32.xlu0 %v1401_v49  ;;  %v1502_v26 = vpop.permute.xlu0 %1501 }
0x11e1   :  { %v1595_v16 = vpop.permute.xlu0 %1594 }
0x11e9   :  { %v2240_v17 = vpop.permute.xlu0 %2239 }
0x11ea   :  { %v2242_v18 = vunpack.i.h.bf16 %v2240_v17  ;;  %v2241_v19 = vunpack.i.l.bf16 %v2240_v17 }
0x11ec   :  { %1679 = vmatpush.msrb.mxu3 %v2241_v19 }
0x11ee   :  { %1680 = vmatpush.msrb.mxu3 %v2242_v18 }
0x11ef   :  { %1974 = vmatmul.msk.f32.vlgmr.msrb.gmra.mxu3 %vm806_vm6, %v3016_v37 }
0x11f1   :  { %v3084_v28 = vpop.permute.xlu0 %1690 }
0x11f9   :  { %v3086_v53 = vpop.permute.xlu0 %2259 }
0x11fa   :  { %v2262_v13 = vunpack.i.h.bf16 %v3086_v53  ;;  %v2261_v43 = vunpack.i.l.bf16 %v3086_v53 }
0x1201   :  { %v2270_v21 = vpop.permute.xlu0 %2269 }
0x1202   :  { %v2271_v3 = vunpack.i.l.bf16 %v2270_v21  ;;  %v2272_v9 = vunpack.i.h.bf16 %v2270_v21 }
0x1209   :  { %v3088_v23 = vpop.permute.xlu0 %2284 }
0x1211   :  { %v2290_v24 = vpop.permute.xlu0 %2289 }
0x1212   :  { %v2292_v38 = vunpack.i.h.bf16 %v2290_v24  ;;  %v2291_v25 = vunpack.i.l.bf16 %v2290_v24 }
0x1214   :  { %1873 = vmatpush.msra.mxu3 %v2291_v25  ;;  %v3127_v25 = vld [vmem:[%s3172_s10 + $0x5] ss:$0 sm:$0xff] }
0x1216   :  { %1874 = vmatpush.msra.mxu3 %v2292_v38 }
0x124f   :  { %v1591_v45 = vpop.f32.mrf.mxu1 }
0x1255   :  { %v1523_v33 = vpop.f32.mrf.mxu3 }
0x1256   :  { %v1524_v35 = vadd.f32 %v1523_v33, %v1502_v26 }
0x1258   :  { %v1526_v32 = vmax.f32 %v1524_v35, 0.0 }
0x125a   :  { %1971 = vmatmul.msk.f32.vlgmr.msrb.gmra.mxu0 %vm125_vm1, %v1526_v32 }
0x1272   :  { %v1682_v42 = vpop.f32.mrf.mxu3 }
0x12d7   :  { %v1559_v12 = vpop.f32.mrf.mxu0 }
0x12d8   :  { %v1592_v39 = vadd.f32 %v1591_v45, %v1559_v12  ;;  %v2286_v45 = vunpack.i.l.bf16 %v3088_v23  ;;  %v2287_v12 = vunpack.i.h.bf16 %v3088_v23 }
0x12da   :  { %v1597_v15 = vadd.f32 %v1595_v16, %v1592_v39  ;;  %v1732_v16 = vsel %vm1324_vm10, %v2261_v43, %v2262_v13 }
0x12dc   :  { %2329 = vtanh.f32 %v1597_v15 }
0x12e2   :  { %v3093_v47 = vpop.eup %2329 }
0x12e3   :  { %v1599_v54 = vmul.f32 1.442695, %v3093_v47 }
0x12e5   :  { %2331 = vpow2.f32 %v1599_v54 }
0x12eb   :  { %v2332_v52 = vpop.eup %2331 }
0x12ec   :  { %1602 = vrot.lane.b32.xlu1 %v2332_v52, %s2349_s28 }
0x12f4   :  { %2244 = vrot.lane.b32.xlu1 %v2243_v34, %s2352_s18 }
0x12fc   :  { %2249 = vrot.lane.b32.xlu1 %v2248_v46, %s2351_s1 }
0x135e   :  { %v1603_v60 = vpop.permute.xlu1 %1602 }
0x135f   :  { %v1605_v61 = vmul.f32 %v1603_v60, %v3016_v37  ;;  %v2263_v37 = vpack.i.bf16 %v3054_v36, %v2951_v11  ;;  %v995_v60 = vsel %vm258_vm5, %v2837_v63, 0.0  ;;  %v378_v63 = vpop.permute.xlu0 %377 }
0x1361   :  { %v1606_v1 = vadd.f32 %v1605_v61, %v1597_v15  ;;  %2264 = vrot.lane.b32.xlu1 %v2263_v37, %s2351_s1 }
0x1363   :  { %1616 = vrot.lane.b32.xlu2 %v1606_v1, %s2354_s5 }
0x1366   :  { %v2245_v2 = vpop.permute.xlu1 %2244 }
0x1367   :  { %v2247_v4 = vunpack.i.h.bf16 %v2245_v2  ;;  %v2246_v8 = vunpack.i.l.bf16 %v2245_v2 }
0x1369   :  { %v1630_v62 = vsel %vm125_vm1, %v2246_v8, %v2247_v4  ;;  %2274 = vrot.lane.b32.xlu1 %v3057_v57, %s2339_s4 }
0x136a   :  { %1651 = vmatpush.msra.mxu2 %v1630_v62 }
0x136b   :  { %2254 = vrot.lane.b32.xlu2 %v2253_v50, %s2351_s1 }
0x136c   :  { %1821 = vmatpush.msrb.mxu2 %v2271_v3 }
0x136e   :  { %1822 = vmatpush.msrb.mxu2 %v2272_v9  ;;  %v2250_v48 = vpop.permute.xlu1 %2249 }
0x136f   :  { %v2252_v31 = vunpack.i.h.bf16 %v2250_v48  ;;  %v2251_v49 = vunpack.i.l.bf16 %v2250_v48 }
0x1371   :  { %1829 = vrot.lane.b32.xlu1 %v3001_v41, %s2338_s30  ;;  %v1734_v26 = vsel %vm1324_vm10, %v2251_v49, %v2252_v31  ;;  %v1607_v31 = vsel %vm806_vm6, %v3093_v47, 0.0  ;;  %v2355_v49 = vmov 96  }
0x1372   :  { %1753 = vmatpush.msra.mxu0 %v1734_v26  ;;  %2298 = vset.pattern.permute.xlu0 %v2355_v49 }
0x13bd   :  { %v1617_v51 = vpop.permute.xlu2 %1616 }
0x13be   :  { %1973 = vmatmul.msk.f32.vlgmr.msra.gmra.mxu2 %vm806_vm6, %v1617_v51  ;;  %v1198_v51 = vmul.f32 -0.5, %v2855_v10 }
0x13c0   :  { %v1199_v13 = vmul.f32 %v1198_v51, %v2855_v10 }
0x13c5   :  { %v2255_v40 = vpop.permute.xlu2 %2254 }
0x13c6   :  { %v2257_v11 = vunpack.i.h.bf16 %v2255_v40  ;;  %v2256_v36 = vunpack.i.l.bf16 %v2255_v40 }
0x13c8   :  { %v1733_v57 = vsel %vm1324_vm10, %v2256_v36, %v2257_v11  ;;  %v762_v11 = vpop.xlane.xlu0 %761 }
0x13c9   :  { %1754 = vmatpush.msra.mxu0 %v1733_v57 }
0x13cb   :  { %1755 = vmatpush.msra.mxu0 %v1732_v16 }
0x13d0   :  { %v1403_v57 = vpop.xlane.xlu0 %1402 }
0x13d3   :  { %v2265_v17 = vpop.permute.xlu1 %2264 }
0x13d4   :  { %v2267_v18 = vunpack.i.h.bf16 %v2265_v17  ;;  %v2266_v19 = vunpack.i.l.bf16 %v2265_v17 }
0x13d6   :  { %v1731_v53 = vsel %vm1324_vm10, %v2266_v19, %v2267_v18 }
0x13d7   :  { %1756 = vmatpush.msra.mxu0 %v1731_v53 }
0x13db   :  { %v2275_v21 = vpop.permute.xlu1 %2274 }
0x13dc   :  { %v2277_v24 = vunpack.i.h.bf16 %v2275_v21  ;;  %v2276_v38 = vunpack.i.l.bf16 %v2275_v21 }
0x13de   :  { %1823 = vmatpush.msrb.mxu2 %v2276_v38 }
0x13e0   :  { %1824 = vmatpush.msrb.mxu2 %v2277_v24 }
0x13e3   :  { %v1830_v52 = vpop.permute.xlu1 %1829 }
0x1441   :  { %v1653_v27 = vpop.f32.mrf.mxu2 }
0x1442   :  { %v1683_v29 = vadd.f32 %v1682_v42, %v1653_v27 }
0x1444   :  { %v1689_v6 = vadd.f32 %v3127_v25, %v1683_v29 }
0x1446   :  { %v1693_v0 = vadd.f32 %v3084_v28, %v1689_v6 }
0x1448   :  { %v1694_v30 = vmax.f32 %v1693_v0, 0.0 }
0x144a   :  { %1705 = vrot.lane.b32.xlu2 %v1694_v30, %s2338_s30 }
0x1452   :  { %2279 = vrot.lane.b32.xlu2 %v3047_v56, %s2340_s0 }
0x14a4   :  { %v1706_v33 = vpop.permute.xlu2 %1705 }
0x14a5   :  { %1975 = vmatmul.msk.f32.vlgmr.msra.gmra.mxu0 %vm125_vm1, %v1706_v33  ;;  %1977 = vmatmul.msk.f32.vlgmr.msrb.gmra.mxu2 %vm125_vm1, %v1706_v33 }
0x14ac   :  { %v2280_v35 = vpop.permute.xlu2 %2279 }
0x14ad   :  { %v2282_v32 = vunpack.i.h.bf16 %v2280_v35  ;;  %v2281_v44 = vunpack.i.l.bf16 %v2280_v35 }
0x14af   :  { %1789 = vmatpush.msra.mxu1 %v2281_v44 }
0x14b1   :  { %1790 = vmatpush.msra.mxu1 %v2282_v32 }
0x14b3   :  { %1791 = vmatpush.msra.mxu1 %v2286_v45 }
0x14b5   :  { %1792 = vmatpush.msra.mxu1 %v2287_v12 }
0x1522   :  { %v1758_v28 = vpop.f32.mrf.mxu0 }
0x1523   :  { %v1759_v39 = vadd.f32 %v3001_v41, %v1758_v28  ;;  %v558_v41 = vsel %vm258_vm5, %v2699_v20, 0.0  ;;  %v2337_v20 = vld [vmem:[%s3178_s2] sm:$0xff] }
0x1525   :  { %v1761_v56 = vmax.f32 %v1759_v39, 0.0 }
0x1527   :  { %1976 = vmatmul.msk.f32.vlgmr.msra.gmra.mxu1 %vm125_vm1, %v1761_v56 }
0x1528   :  { %v1826_v15 = vpop.f32.mrf.mxu2 }
0x15a4   :  { %v1794_v54 = vpop.f32.mrf.mxu1 }
0x15a5   :  { %v1827_v34 = vadd.f32 %v1826_v15, %v1794_v54 }
0x15a7   :  { %v1832_v7 = vadd.f32 %v1830_v52, %v1827_v34 }
0x15a9   :  { %2333 = vtanh.f32 %v1832_v7 }
0x15af   :  { %v2334_v14 = vpop.eup %2333 }
0x15b0   :  { %v1834_v55 = vmul.f32 1.442695, %v2334_v14  ;;  %v1842_v58 = vsel %vm806_vm6, %v2334_v14, 0.0 }
0x15b1   :  { %1843 = vadd.xlane.f32.xlu0 %v1842_v58 }
0x15b2   :  { %2335 = vpow2.f32 %v1834_v55 }
0x15b8   :  { %v2336_v23 = vpop.eup %2335 }
0x15b9   :  { %1837 = vrot.lane.b32.xlu2 %v2336_v23, %s2349_s28 }
0x15c1   :  { %2294 = vrot.lane.b32.xlu2 %v3070_v59, %s2338_s30  ;;  %v374_v59 = vmul.f32 -0.5, %v2337_v20 }
0x15c3   :  { %v375_v9 = vmul.f32 %v2337_v20, %v374_v59 }
0x15c5   :  { %v380_v62 = vsub.f32 %v375_v9, %v378_v63 }
0x15c7   :  { %v381_v46 = vsel %vm157_vm3, %v380_v62, 0.0 }
0x15ea   :  { %559 = vadd.xlane.f32.xlu2 %v558_v41 }
0x15f2   :  { %996 = vadd.xlane.f32.xlu2 %v995_v60 }
0x1613   :  { %v1838_v61 = vpop.permute.xlu2 %1837 }
0x1614   :  { %v1840_v1 = vmul.f32 %v1838_v61, %v1689_v6 }
0x1616   :  { %v1841_v2 = vadd.f32 %v1840_v1, %v1832_v7 }
0x1618   :  { %1849 = vrot.lane.b32.xlu1 %v1841_v2, %s2354_s5 }
0x161b   :  { %v2295_v3 = vpop.permute.xlu2 %2294 }
0x161c   :  { %v2297_v4 = vunpack.i.h.bf16 %v2295_v3  ;;  %v2296_v8 = vunpack.i.l.bf16 %v2295_v3 }
0x161e   :  { %1902 = vmatpush.msrb.mxu0 %v2296_v8 }
0x1620   :  { %1903 = vmatpush.msrb.mxu0 %v2297_v4 }
0x1621   :  { %1979 = vmatmul.msk.f32.vlgmr.msrb.gmra.mxu0 %vm806_vm6, %v1689_v6 }
0x1624   :  { %v1844_v53 = vpop.xlane.xlu0 %1843 }
0x1642   :  { %382 = vadd.xlane.f32.xlu1 %v381_v46 }
0x165b   :  { %1201 = vrot.lane.b32.xlu1 %v2904_v5, %s2338_s30 }
0x165d   :  { %v560_v5 = vpop.xlane.xlu2 %559 }
0x165e   :  { %v763_v10 = vadd.f32 %v762_v11, %v560_v5 }
0x1665   :  { %v997_v36 = vpop.xlane.xlu2 %996 }
0x1666   :  { %v998_v16 = vadd.f32 %v997_v36, %v763_v10 }
0x168a   :  { %v1850_v50 = vpop.permute.xlu1 %1849 }
0x168b   :  { %1978 = vmatmul.msk.f32.vlgmr.msra.gmra.mxu3 %vm806_vm6, %v1850_v50 }
0x169e   :  { %v1905_v27 = vpop.f32.mrf.mxu0 }
0x16b5   :  { %v383_v37 = vpop.xlane.xlu1 %382 }
0x16b6   :  { %v999_v18 = vsub.f32 %v383_v37, %v998_v16 }
0x16cd   :  { %v1202_v43 = vpop.permute.xlu1 %1201 }
0x16ce   :  { %v1204_v48 = vsub.f32 %v1199_v13, %v1202_v43 }
0x16d0   :  { %v1205_v40 = vsel %vm125_vm1, %v1204_v48, 0.0 }
0x16d1   :  { %1206 = vadd.xlane.f32.xlu2 %v1205_v40 }
0x16d9   :  { %1608 = vadd.xlane.f32.xlu2 %v1607_v31 }
0x16f1   :  { %1909 = vrot.lane.b32.xlu2 %v3127_v25, %s2342_s23 }
0x170e   :  { %v1876_v42 = vpop.f32.mrf.mxu3 }
0x170f   :  { %v1906_v29 = vadd.f32 %v1905_v27, %v1876_v42 }
0x1711   :  { %v1908_v0 = vadd.f32 %v1906_v29, %v2631_v22 }
0x1744   :  { %v1207_v26 = vpop.xlane.xlu2 %1206 }
0x1745   :  { %v1208_v21 = vadd.f32 %v1207_v26, %v999_v18 }
0x174c   :  { %v1609_v17 = vpop.xlane.xlu2 %1608 }
0x174d   :  { %v1610_v19 = vadd.f32 %v1609_v17, %v1403_v57 }
0x174f   :  { %v1845_v24 = vadd.f32 %v1844_v53, %v1610_v19 }
0x1751   :  { %v1846_v47 = vsub.f32 %v1208_v21, %v1845_v24 }
0x1753   :  { %v1847_v38 = vadd.f32 %v3127_v25, %v1846_v47 }
0x1754   :  { %v1910_v6 = vpop.permute.xlu2 %1909 }
0x1755   :  { %1915 = vperm.xlu0 %2298, %v1847_v38   ;;  %v1912_v30 = vadd.f32 %v1910_v6, %v1908_v0 }
0x17c7   :  { %v1916_v33 = vpop.permute.xlu0 %1915 }
0x17c8   :  { %v1918_v35 = vsel %vm125_vm1, %v1912_v30, %v1916_v33 }
0x17c9   :  { %1919 = vst.msk [vmem:[%s3182_s11] sm:$0xff] %vm1159_vm9, %v1918_v35 }

</bundles_post_ra>
